<compile_context>
chip_gen: v5e
topology: v5e:2x2
jax: 0.10.0
libtpu: 0.0.40
codegen_flags: <defaults>
</compile_context>

<pallas_src>
import functools

import jax
import jax.numpy as jnp
import numpy as np
from jax.experimental import pallas as pl
from jax.experimental.pallas import tpu as pltpu


def _round_up(x, m):
    return (x + m - 1) // m * m


def _choose_images_per_step(n, max_imgs=4):
    """Pack >=1 image per grid step, keep >=2 grid steps when possible (v7x),
    and require divisibility so the BlockSpec tiles exactly."""
    if n <= 1:
        return 1
    b = min(max_imgs, n // 2)
    b = max(b, 1)
    while n % b:
        b -= 1
    return max(b, 1)


def _residual_block_kernel(x_ref, w1_ref, b1_ref, w2_ref, b2_ref, o_ref,
                           hp_ref, *, W, pad, split_conv2):
    # x_ref : (B, Cin, HW) f32          w1_ref: (Cmid, Cin)    bf16 (BN-scaled)
    # b1_ref: (Cmid, 1)    f32          w2_ref: (Cout, 9*Cmid) bf16 (BN-scaled)
    # b2_ref: (Cout, 1)    f32          o_ref : (B, Cout, HW)  f32
    # hp_ref: (Cmid, pad + HW + pad) bf16 VMEM scratch with zero halos.
    B, Cin, HW = x_ref.shape
    Cmid = w1_ref.shape[0]
    Cout = w2_ref.shape[0]

    # Horizontal wrap masks, built once per step at (1, HW) and broadcast.
    col = jax.lax.broadcasted_iota(jnp.int32, (1, HW), 1) % W
    mask_l = col >= 1          # kills wrap for kx == 0 taps
    mask_r = col <= W - 2      # kills wrap for kx == 2 taps

    # Zero the halos once per step (the h writes below never touch them);
    # re-zeroing keeps the kernel correct when the batch axis is sharded
    # across TensorCores.  Aligned, cheap stores (pad is a multiple of 128).
    zero_halo = jnp.zeros((Cmid, pad), jnp.bfloat16)
    hp_ref[:, :pad] = zero_halo
    hp_ref[:, pad + HW:] = zero_halo

    # TODO(synk): if the bundle shows vld/XLU as the binding slot, replace the
    # 8 unaligned tap reads with 3 base reads (one per ky) + pltpu.roll.
    def tap(ky, kx):
        s = (ky - 1) * W + (kx - 1)
        sub = hp_ref[:, pad + s:pad + s + HW]            # (Cmid, HW) bf16
        # TODO(synk): on v5e these bf16 selects unpack to f32 on the VPU;
        # only worth reworking if vsel is the saturated slot there.
        if kx == 0:
            sub = jnp.where(mask_l, sub, 0.0)
        elif kx == 2:
            sub = jnp.where(mask_r, sub, 0.0)
        return sub

    # Static unroll over the images packed into this grid step.  Each image
    # gets its own scratch fill, so the vertical halo stays per-image and the
    # 3x3 taps never read the neighbouring image's rows.
    for b in range(B):
        x = x_ref[b]                                     # (Cin, HW) f32

        # ---- conv1 (1x1): MXU channel matmul; BN scale folded into w1 ------
        h = jnp.dot(w1_ref[...], x.astype(jnp.bfloat16),
                    preferred_element_type=jnp.float32)  # (Cmid, HW) f32
        h = jnp.maximum(h + b1_ref[...], 0.0)

        hp_ref[:, pad:pad + HW] = h.astype(jnp.bfloat16)

        # ---- conv2 (3x3, pad=1) over im2col taps; BN scale folded into w2 --
        if split_conv2:
            # Per-ky accumulate matmuls (K = 3*Cmid each): peak live im2col
            # data is ~1/3 of the deep-concat version; important at DarkNet
            # channel counts against v7x's 64 MiB VMEM.
            acc = jnp.zeros((Cout, HW), jnp.float32)
            for ky in range(3):
                patches = jnp.concatenate([tap(ky, kx) for kx in range(3)],
                                          axis=0)        # (3*Cmid, HW) bf16
                acc = acc + jnp.dot(
                    w2_ref[:, ky * 3 * Cmid:(ky + 1) * 3 * Cmid], patches,
                    preferred_element_type=jnp.float32)
        else:
            # Tiny Cmid: one deep K = 9*Cmid matmul keeps MXU depth utilised.
            patches = jnp.concatenate(
                [tap(ky, kx) for ky in range(3) for kx in range(3)],
                axis=0)                                  # (9*Cmid, HW) bf16
            acc = jnp.dot(w2_ref[...], patches,
                          preferred_element_type=jnp.float32)

        out = jnp.maximum(acc + b2_ref[...], 0.0)        # (Cout, HW) f32

        # ---- residual add (f32) and lane-dense store ------------------------
        o_ref[b] = (out + x).astype(o_ref.dtype)


def residual_block(x_nchw, params):
    """x_nchw: (N, C, H, W) float32; returns (N, C, H, W) float32."""
    w1, b1, w2, b2 = params
    N, C, H, W = x_nchw.shape
    Cmid = w1.shape[0]
    Cout = w2.shape[0]
    assert Cout == C, "residual add requires in_channels == out_channels"
    HW = H * W
    pad = _round_up(W + 1, 128)        # lane-aligned left/right halo
    B = _choose_images_per_step(N)     # images per grid step
    split_conv2 = Cmid >= 128          # accumulate matmuls at production Cmid

    # NCHW with spatial flattened is already lane-dense -> no transposes.
    x_flat = x_nchw.reshape(N, C, HW).astype(jnp.float32)

    flops = 2 * N * HW * (C * Cmid + 9 * Cmid * Cout)
    bytes_accessed = ((x_flat.size + N * Cout * HW) * 4
                      + (w1.size + w2.size) * 2
                      + (b1.size + b2.size) * 4)

    kernel = functools.partial(_residual_block_kernel, W=W, pad=pad,
                               split_conv2=split_conv2)

    # TODO(synk): for large DarkNet feature maps add a spatial grid axis that
    # tiles H into row strips (1-row halo, overlapping reads), budgeted per
    # generation (v7x: 64 MiB VMEM / 32 MiB scoped default) with
    # vmem_limit_bytes set explicitly and pl.Buffered(1) on the grid-invariant
    # weight specs to drop their second buffer.
    out_flat = pl.pallas_call(
        kernel,
        out_shape=jax.ShapeDtypeStruct((N, C, HW), jnp.float32),
        grid_spec=pltpu.PrefetchScalarGridSpec(
            num_scalar_prefetch=0,
            grid=(N // B,),
            in_specs=[
                pl.BlockSpec((B, C, HW), lambda n: (n, 0, 0)),
                pl.BlockSpec(w1.shape, lambda n: (0, 0)),
                pl.BlockSpec(b1.shape, lambda n: (0, 0)),
                pl.BlockSpec(w2.shape, lambda n: (0, 0)),
                pl.BlockSpec(b2.shape, lambda n: (0, 0)),
            ],
            out_specs=pl.BlockSpec((B, C, HW), lambda n: (n, 0, 0)),
            scratch_shapes=[pltpu.VMEM((Cmid, HW + 2 * pad), jnp.bfloat16)],
        ),
        compiler_params=pltpu.CompilerParams(
            dimension_semantics=("parallel",)),
        cost_estimate=pl.CostEstimate(
            flops=int(flops), transcendentals=0,
            bytes_accessed=int(bytes_accessed)),
    )(x_flat, w1, b1, w2, b2)

    return out_flat.reshape(N, C, H, W)


def init_params(key, in_channels, out_channels):
    """Deterministic synthetic parameters mirroring the PyTorch module shapes."""
    out_chls = out_channels // 2
    eps = 1e-5
    ks = jax.random.split(key, 12)

    # conv1: PyTorch Conv2d weight (out_chls, in_ch, 1, 1), bias (out_chls,)
    w1_t = 0.10 * jax.random.normal(ks[0], (out_chls, in_channels, 1, 1), jnp.float32)
    b1_t = 0.10 * jax.random.normal(ks[1], (out_chls,), jnp.float32)
    g1 = 1.0 + 0.1 * jax.random.normal(ks[2], (out_chls,), jnp.float32)
    be1 = 0.1 * jax.random.normal(ks[3], (out_chls,), jnp.float32)
    m1 = 0.1 * jax.random.normal(ks[4], (out_chls,), jnp.float32)
    v1 = jnp.abs(1.0 + 0.1 * jax.random.normal(ks[5], (out_chls,), jnp.float32))

    # conv2: PyTorch Conv2d weight (out_ch, out_chls, 3, 3), bias (out_ch,)
    w2_t = 0.05 * jax.random.normal(ks[6], (out_channels, out_chls, 3, 3), jnp.float32)
    b2_t = 0.10 * jax.random.normal(ks[7], (out_channels,), jnp.float32)
    g2 = 1.0 + 0.1 * jax.random.normal(ks[8], (out_channels,), jnp.float32)
    be2 = 0.1 * jax.random.normal(ks[9], (out_channels,), jnp.float32)
    m2 = 0.1 * jax.random.normal(ks[10], (out_channels,), jnp.float32)
    v2 = jnp.abs(1.0 + 0.1 * jax.random.normal(ks[11], (out_channels,), jnp.float32))

    # Fold conv bias + BN (inference) into per-channel scale / bias:
    #   BN(Wx + b) = s*(Wx) + (beta + s*(b - mean)),  s = gamma/sqrt(var+eps)
    # The scale s is folded directly into the bf16 weights (perf feedback);
    # only the bias add + ReLU remain in-kernel.
    s1 = g1 / jnp.sqrt(v1 + eps)
    bias1 = be1 + s1 * (b1_t - m1)
    s2 = g2 / jnp.sqrt(v2 + eps)
    bias2 = be2 + s2 * (b2_t - m2)

    # Kernel layouts: conv1 weight (Cmid, Cin); conv2 weight (Cout, 9*Cmid)
    # with columns ordered (ky*3 + kx)*Cmid + ci; both bf16 for the MXU.
    w1 = (w1_t[:, :, 0, 0] * s1[:, None]).astype(jnp.bfloat16)
    w2_flat = jnp.transpose(w2_t, (0, 2, 3, 1)).reshape(out_channels, 9 * out_chls)
    w2 = (w2_flat * s2[:, None]).astype(jnp.bfloat16)

    kernel_params = (w1, bias1.reshape(-1, 1), w2, bias2.reshape(-1, 1))
    raw_params = (w1_t, b1_t, g1, be1, m1, v1, w2_t, b2_t, g2, be2, m2, v2)
    return kernel_params, raw_params


def reference(x_nchw, raw):
    """Pure-JAX NCHW reference replicating the PyTorch module (eval-mode BN)."""
    w1_t, b1_t, g1, be1, m1, v1, w2_t, b2_t, g2, be2, m2, v2 = raw
    eps = 1e-5

    def conv_bn_relu(x, w, b, g, be, m, v, pad):
        y = jax.lax.conv_general_dilated(
            x, w, window_strides=(1, 1),
            padding=[(pad, pad), (pad, pad)],
            dimension_numbers=('NCHW', 'OIHW', 'NCHW'),
            precision=jax.lax.Precision.HIGHEST)
        y = y + b[None, :, None, None]
        y = (y - m[None, :, None, None]) / jnp.sqrt(v[None, :, None, None] + eps)
        y = y * g[None, :, None, None] + be[None, :, None, None]
        return jnp.maximum(y, 0.0)

    h = conv_bn_relu(x_nchw, w1_t, b1_t, g1, be1, m1, v1, 0)
    h = conv_bn_relu(h, w2_t, b2_t, g2, be2, m2, v2, 1)
    return h + x_nchw


if __name__ == "__main__":
    key = jax.random.PRNGKey(0)
    k_x, k_p = jax.random.split(key)

    # ResidualBlock(32, 32) on a (4, 32, 16, 16) NCHW input.  N=4 exercises
    # the image-packing path (2 images per grid step, 2 parallel grid steps).
    N, C, H, W = 4, 32, 16, 16
    x = jax.random.normal(k_x, (N, C, H, W), jnp.float32)
    params, raw = init_params(k_p, C, C)

    out = residual_block(x, params)
    out = jax.block_until_ready(out)

    ref = reference(x, raw)
    assert out.shape == (N, C, H, W)
    # Tolerance accounts for bf16 MXU operands / bf16 intermediate activation
    # vs. the f32 HIGHEST reference.
    np.testing.assert_allclose(np.asarray(out), np.asarray(ref),
                               atol=2e-2, rtol=2e-2)
    print("KERNEL_OK")
</pallas_src>

<mosaic_0001>
module attributes {stable_mosaic.version = 11 : i64} {
  func.func @_residual_block_kernel(%arg0: i32, %arg1: memref<2x32x256xf32, #tpu.memory_space<vmem>>, %arg2: memref<16x32xbf16, #tpu.memory_space<vmem>>, %arg3: memref<16x1xf32, #tpu.memory_space<vmem>>, %arg4: memref<32x144xbf16, #tpu.memory_space<vmem>>, %arg5: memref<32x1xf32, #tpu.memory_space<vmem>>, %arg6: memref<2x32x256xf32, #tpu.memory_space<vmem>>, %arg7: memref<16x512xbf16, #tpu.memory_space<vmem>>) attributes {dimension_semantics = [#tpu.dimension_semantics<parallel>], iteration_bounds = array<i64: 2>, scalar_prefetch = 0 : i64, scratch_operands = 1 : i64, tpu.core_type = #tpu.core_type<tc>, window_params = [{transform_indices = @transform_0, window_bounds = array<i64: 2, 32, 256>}, {pipeline_mode = #tpu.pipeline_mode<synchronous>, transform_indices = @transform_1, window_bounds = array<i64: 16, 32>}, {pipeline_mode = #tpu.pipeline_mode<synchronous>, transform_indices = @transform_2, window_bounds = array<i64: 16, 1>}, {pipeline_mode = #tpu.pipeline_mode<synchronous>, transform_indices = @transform_3, window_bounds = array<i64: 32, 144>}, {pipeline_mode = #tpu.pipeline_mode<synchronous>, transform_indices = @transform_4, window_bounds = array<i64: 32, 1>}, {transform_indices = @transform_5, window_bounds = array<i64: 2, 32, 256>}]} {
    %0 = tpu.iota {dimensions = array<i32: 1>} : vector<1x256xi32>
    %c16_i32 = arith.constant 16 : i32
    %c0_i32 = arith.constant 0 : i32
    %1 = arith.cmpi eq, %c16_i32, %c0_i32 : i32
    %c1_i32 = arith.constant 1 : i32
    %2 = arith.select %1, %c1_i32, %c16_i32 : i32
    %3 = vector.broadcast %2 : i32 to vector<1x256xi32>
    %4 = arith.remsi %0, %3 : vector<1x256xi32>
    %c0_i32_0 = arith.constant 0 : i32
    %5 = vector.broadcast %c0_i32_0 : i32 to vector<1x256xi32>
    %6 = arith.cmpi ne, %4, %5 : vector<1x256xi32>
    %c0_i32_1 = arith.constant 0 : i32
    %7 = vector.broadcast %c0_i32_1 : i32 to vector<1x256xi32>
    %8 = arith.cmpi slt, %4, %7 : vector<1x256xi32>
    %c0_i32_2 = arith.constant 0 : i32
    %9 = arith.cmpi slt, %2, %c0_i32_2 : i32
    %10 = vector.broadcast %9 : i1 to vector<1x256xi1>
    %11 = vector.broadcast %10 : vector<1x256xi1> to vector<1x256xi1>
    %12 = arith.xori %8, %11 : vector<1x256xi1>
    %13 = arith.andi %12, %6 : vector<1x256xi1>
    %14 = vector.broadcast %2 : i32 to vector<1x256xi32>
    %15 = arith.addi %4, %14 : vector<1x256xi32>
    %16 = arith.select %13, %15, %4 : vector<1x256xi1>, vector<1x256xi32>
    %c1_i32_3 = arith.constant 1 : i32
    %17 = vector.broadcast %c1_i32_3 : i32 to vector<1x256xi32>
    %18 = arith.cmpi sge, %16, %17 : vector<1x256xi32>
    %c14_i32 = arith.constant 14 : i32
    %19 = vector.broadcast %c14_i32 : i32 to vector<1x256xi32>
    %20 = arith.cmpi sle, %16, %19 : vector<1x256xi32>
    %cst = arith.constant 0.000000e+00 : bf16
    %21 = vector.broadcast %cst : bf16 to vector<16x128xbf16>
    %c0 = arith.constant 0 : index
    %c0_4 = arith.constant 0 : index
    %22 = vector.load %arg7[%c0, %c0_4] : memref<16x512xbf16, #tpu.memory_space<vmem>>, vector<16x128xbf16>
    tpu.vector_store %arg7[%c0, %c0_4], %21 {strides = array<i32>} : memref<16x512xbf16, #tpu.memory_space<vmem>>, vector<16x128xbf16>,
    %c0_5 = arith.constant 0 : index
    %c384 = arith.constant 384 : index
    %23 = vector.load %arg7[%c0_5, %c384] : memref<16x512xbf16, #tpu.memory_space<vmem>>, vector<16x128xbf16>
    tpu.vector_store %arg7[%c0_5, %c384], %21 {strides = array<i32>} : memref<16x512xbf16, #tpu.memory_space<vmem>>, vector<16x128xbf16>,
    %c0_6 = arith.constant 0 : index
    %c0_7 = arith.constant 0 : index
    %c0_8 = arith.constant 0 : index
    %24 = vector.load %arg1[%c0_6, %c0_7, %c0_8] : memref<2x32x256xf32, #tpu.memory_space<vmem>>, vector<1x32x256xf32>
    %25 = vector.shape_cast %24 : vector<1x32x256xf32> to vector<32x256xf32>
    %c0_9 = arith.constant 0 : index
    %c0_10 = arith.constant 0 : index
    %26 = vector.load %arg2[%c0_9, %c0_10] : memref<16x32xbf16, #tpu.memory_space<vmem>>, vector<16x32xbf16>
    %27 = arith.truncf %25 : vector<32x256xf32> to vector<32x256xbf16>
    %cst_11 = arith.constant dense<0.000000e+00> : vector<16x256xf32>
    %28 = tpu.matmul %26, %27, %cst_11 {dimension_numbers = #tpu.dot_dimension_numbers<[1], [0], [0], [1], [0, 0, 1, 1], [], []>} : vector<16x32xbf16>, vector<32x256xbf16>, vector<16x256xf32> -> vector<16x256xf32>
    %c0_12 = arith.constant 0 : index
    %c0_13 = arith.constant 0 : index
    %29 = vector.load %arg3[%c0_12, %c0_13] : memref<16x1xf32, #tpu.memory_space<vmem>>, vector<16x1xf32>
    %30 = vector.broadcast %29 : vector<16x1xf32> to vector<16x256xf32>
    %31 = arith.addf %28, %30 : vector<16x256xf32>
    %cst_14 = arith.constant 0.000000e+00 : f32
    %32 = vector.broadcast %cst_14 : f32 to vector<16x256xf32>
    %33 = arith.maximumf %31, %32 : vector<16x256xf32>
    %34 = arith.truncf %33 : vector<16x256xf32> to vector<16x256xbf16>
    %c0_15 = arith.constant 0 : index
    %c128 = arith.constant 128 : index
    %35 = vector.load %arg7[%c0_15, %c128] : memref<16x512xbf16, #tpu.memory_space<vmem>>, vector<16x256xbf16>
    tpu.vector_store %arg7[%c0_15, %c128], %34 {strides = array<i32>} : memref<16x512xbf16, #tpu.memory_space<vmem>>, vector<16x256xbf16>,
    %c0_16 = arith.constant 0 : index
    %c111 = arith.constant 111 : index
    %36 = vector.load %arg7[%c0_16, %c111] : memref<16x512xbf16, #tpu.memory_space<vmem>>, vector<16x256xbf16>
    %cst_17 = arith.constant 0.000000e+00 : f32
    %37 = arith.truncf %cst_17 : f32 to bf16
    %38 = vector.shape_cast %18 : vector<1x256xi1> to vector<1x256xi1>
    %39 = vector.broadcast %38 : vector<1x256xi1> to vector<16x256xi1>
    %40 = vector.broadcast %37 : bf16 to vector<16x256xbf16>
    %41 = arith.select %39, %36, %40 : vector<16x256xi1>, vector<16x256xbf16>
    %c0_18 = arith.constant 0 : index
    %c112 = arith.constant 112 : index
    %42 = vector.load %arg7[%c0_18, %c112] : memref<16x512xbf16, #tpu.memory_space<vmem>>, vector<16x256xbf16>
    %c0_19 = arith.constant 0 : index
    %c113 = arith.constant 113 : index
    %43 = vector.load %arg7[%c0_19, %c113] : memref<16x512xbf16, #tpu.memory_space<vmem>>, vector<16x256xbf16>
    %cst_20 = arith.constant 0.000000e+00 : f32
    %44 = arith.truncf %cst_20 : f32 to bf16
    %45 = vector.shape_cast %20 : vector<1x256xi1> to vector<1x256xi1>
    %46 = vector.broadcast %45 : vector<1x256xi1> to vector<16x256xi1>
    %47 = vector.broadcast %44 : bf16 to vector<16x256xbf16>
    %48 = arith.select %46, %43, %47 : vector<16x256xi1>, vector<16x256xbf16>
    %c0_21 = arith.constant 0 : index
    %c127 = arith.constant 127 : index
    %49 = vector.load %arg7[%c0_21, %c127] : memref<16x512xbf16, #tpu.memory_space<vmem>>, vector<16x256xbf16>
    %cst_22 = arith.constant 0.000000e+00 : f32
    %50 = arith.truncf %cst_22 : f32 to bf16
    %51 = vector.shape_cast %18 : vector<1x256xi1> to vector<1x256xi1>
    %52 = vector.broadcast %51 : vector<1x256xi1> to vector<16x256xi1>
    %53 = vector.broadcast %50 : bf16 to vector<16x256xbf16>
    %54 = arith.select %52, %49, %53 : vector<16x256xi1>, vector<16x256xbf16>
    %c0_23 = arith.constant 0 : index
    %c128_24 = arith.constant 128 : index
    %55 = vector.load %arg7[%c0_23, %c128_24] : memref<16x512xbf16, #tpu.memory_space<vmem>>, vector<16x256xbf16>
    %c0_25 = arith.constant 0 : index
    %c129 = arith.constant 129 : index
    %56 = vector.load %arg7[%c0_25, %c129] : memref<16x512xbf16, #tpu.memory_space<vmem>>, vector<16x256xbf16>
    %cst_26 = arith.constant 0.000000e+00 : f32
    %57 = arith.truncf %cst_26 : f32 to bf16
    %58 = vector.shape_cast %20 : vector<1x256xi1> to vector<1x256xi1>
    %59 = vector.broadcast %58 : vector<1x256xi1> to vector<16x256xi1>
    %60 = vector.broadcast %57 : bf16 to vector<16x256xbf16>
    %61 = arith.select %59, %56, %60 : vector<16x256xi1>, vector<16x256xbf16>
    %c0_27 = arith.constant 0 : index
    %c143 = arith.constant 143 : index
    %62 = vector.load %arg7[%c0_27, %c143] : memref<16x512xbf16, #tpu.memory_space<vmem>>, vector<16x256xbf16>
    %cst_28 = arith.constant 0.000000e+00 : f32
    %63 = arith.truncf %cst_28 : f32 to bf16
    %64 = vector.shape_cast %18 : vector<1x256xi1> to vector<1x256xi1>
    %65 = vector.broadcast %64 : vector<1x256xi1> to vector<16x256xi1>
    %66 = vector.broadcast %63 : bf16 to vector<16x256xbf16>
    %67 = arith.select %65, %62, %66 : vector<16x256xi1>, vector<16x256xbf16>
    %c0_29 = arith.constant 0 : index
    %c144 = arith.constant 144 : index
    %68 = vector.load %arg7[%c0_29, %c144] : memref<16x512xbf16, #tpu.memory_space<vmem>>, vector<16x256xbf16>
    %c0_30 = arith.constant 0 : index
    %c145 = arith.constant 145 : index
    %69 = vector.load %arg7[%c0_30, %c145] : memref<16x512xbf16, #tpu.memory_space<vmem>>, vector<16x256xbf16>
    %cst_31 = arith.constant 0.000000e+00 : f32
    %70 = arith.truncf %cst_31 : f32 to bf16
    %71 = vector.shape_cast %20 : vector<1x256xi1> to vector<1x256xi1>
    %72 = vector.broadcast %71 : vector<1x256xi1> to vector<16x256xi1>
    %73 = vector.broadcast %70 : bf16 to vector<16x256xbf16>
    %74 = arith.select %72, %69, %73 : vector<16x256xi1>, vector<16x256xbf16>
    %75 = tpu.concatenate %41, %42, %48, %54, %55, %61, %67, %68, %74 in 0 : vector<16x256xbf16>, vector<16x256xbf16>, vector<16x256xbf16>, vector<16x256xbf16>, vector<16x256xbf16>, vector<16x256xbf16>, vector<16x256xbf16>, vector<16x256xbf16>, vector<16x256xbf16> -> vector<144x256xbf16>
    %c0_32 = arith.constant 0 : index
    %c0_33 = arith.constant 0 : index
    %76 = vector.load %arg4[%c0_32, %c0_33] : memref<32x144xbf16, #tpu.memory_space<vmem>>, vector<32x144xbf16>
    %cst_34 = arith.constant dense<0.000000e+00> : vector<32x256xf32>
    %77 = tpu.matmul %76, %75, %cst_34 {dimension_numbers = #tpu.dot_dimension_numbers<[1], [0], [0], [1], [0, 0, 1, 1], [], []>} : vector<32x144xbf16>, vector<144x256xbf16>, vector<32x256xf32> -> vector<32x256xf32>
    %c0_35 = arith.constant 0 : index
    %c0_36 = arith.constant 0 : index
    %78 = vector.load %arg5[%c0_35, %c0_36] : memref<32x1xf32, #tpu.memory_space<vmem>>, vector<32x1xf32>
    %79 = vector.broadcast %78 : vector<32x1xf32> to vector<32x256xf32>
    %80 = arith.addf %77, %79 : vector<32x256xf32>
    %cst_37 = arith.constant 0.000000e+00 : f32
    %81 = vector.broadcast %cst_37 : f32 to vector<32x256xf32>
    %82 = arith.maximumf %80, %81 : vector<32x256xf32>
    %83 = arith.addf %82, %25 : vector<32x256xf32>
    %c0_38 = arith.constant 0 : index
    %c0_39 = arith.constant 0 : index
    %c0_40 = arith.constant 0 : index
    %84 = vector.load %arg6[%c0_38, %c0_39, %c0_40] : memref<2x32x256xf32, #tpu.memory_space<vmem>>, vector<1x32x256xf32>
    %85 = vector.shape_cast %84 : vector<1x32x256xf32> to vector<32x256xf32>
    %86 = vector.shape_cast %83 : vector<32x256xf32> to vector<1x32x256xf32>
    tpu.vector_store %arg6[%c0_38, %c0_39, %c0_40], %86 {strides = array<i32>} : memref<2x32x256xf32, #tpu.memory_space<vmem>>, vector<1x32x256xf32>,
    %c1 = arith.constant 1 : index
    %c0_41 = arith.constant 0 : index
    %c0_42 = arith.constant 0 : index
    %87 = vector.load %arg1[%c1, %c0_41, %c0_42] : memref<2x32x256xf32, #tpu.memory_space<vmem>>, vector<1x32x256xf32>
    %88 = vector.shape_cast %87 : vector<1x32x256xf32> to vector<32x256xf32>
    %c0_43 = arith.constant 0 : index
    %c0_44 = arith.constant 0 : index
    %89 = vector.load %arg2[%c0_43, %c0_44] : memref<16x32xbf16, #tpu.memory_space<vmem>>, vector<16x32xbf16>
    %90 = arith.truncf %88 : vector<32x256xf32> to vector<32x256xbf16>
    %cst_45 = arith.constant dense<0.000000e+00> : vector<16x256xf32>
    %91 = tpu.matmul %89, %90, %cst_45 {dimension_numbers = #tpu.dot_dimension_numbers<[1], [0], [0], [1], [0, 0, 1, 1], [], []>} : vector<16x32xbf16>, vector<32x256xbf16>, vector<16x256xf32> -> vector<16x256xf32>
    %c0_46 = arith.constant 0 : index
    %c0_47 = arith.constant 0 : index
    %92 = vector.load %arg3[%c0_46, %c0_47] : memref<16x1xf32, #tpu.memory_space<vmem>>, vector<16x1xf32>
    %93 = vector.broadcast %92 : vector<16x1xf32> to vector<16x256xf32>
    %94 = arith.addf %91, %93 : vector<16x256xf32>
    %cst_48 = arith.constant 0.000000e+00 : f32
    %95 = vector.broadcast %cst_48 : f32 to vector<16x256xf32>
    %96 = arith.maximumf %94, %95 : vector<16x256xf32>
    %97 = arith.truncf %96 : vector<16x256xf32> to vector<16x256xbf16>
    %c0_49 = arith.constant 0 : index
    %c128_50 = arith.constant 128 : index
    %98 = vector.load %arg7[%c0_49, %c128_50] : memref<16x512xbf16, #tpu.memory_space<vmem>>, vector<16x256xbf16>
    tpu.vector_store %arg7[%c0_49, %c128_50], %97 {strides = array<i32>} : memref<16x512xbf16, #tpu.memory_space<vmem>>, vector<16x256xbf16>,
    %c0_51 = arith.constant 0 : index
    %c111_52 = arith.constant 111 : index
    %99 = vector.load %arg7[%c0_51, %c111_52] : memref<16x512xbf16, #tpu.memory_space<vmem>>, vector<16x256xbf16>
    %cst_53 = arith.constant 0.000000e+00 : f32
    %100 = arith.truncf %cst_53 : f32 to bf16
    %101 = vector.shape_cast %18 : vector<1x256xi1> to vector<1x256xi1>
    %102 = vector.broadcast %101 : vector<1x256xi1> to vector<16x256xi1>
    %103 = vector.broadcast %100 : bf16 to vector<16x256xbf16>
    %104 = arith.select %102, %99, %103 : vector<16x256xi1>, vector<16x256xbf16>
    %c0_54 = arith.constant 0 : index
    %c112_55 = arith.constant 112 : index
    %105 = vector.load %arg7[%c0_54, %c112_55] : memref<16x512xbf16, #tpu.memory_space<vmem>>, vector<16x256xbf16>
    %c0_56 = arith.constant 0 : index
    %c113_57 = arith.constant 113 : index
    %106 = vector.load %arg7[%c0_56, %c113_57] : memref<16x512xbf16, #tpu.memory_space<vmem>>, vector<16x256xbf16>
    %cst_58 = arith.constant 0.000000e+00 : f32
    %107 = arith.truncf %cst_58 : f32 to bf16
    %108 = vector.shape_cast %20 : vector<1x256xi1> to vector<1x256xi1>
    %109 = vector.broadcast %108 : vector<1x256xi1> to vector<16x256xi1>
    %110 = vector.broadcast %107 : bf16 to vector<16x256xbf16>
    %111 = arith.select %109, %106, %110 : vector<16x256xi1>, vector<16x256xbf16>
    %c0_59 = arith.constant 0 : index
    %c127_60 = arith.constant 127 : index
    %112 = vector.load %arg7[%c0_59, %c127_60] : memref<16x512xbf16, #tpu.memory_space<vmem>>, vector<16x256xbf16>
    %cst_61 = arith.constant 0.000000e+00 : f32
    %113 = arith.truncf %cst_61 : f32 to bf16
    %114 = vector.shape_cast %18 : vector<1x256xi1> to vector<1x256xi1>
    %115 = vector.broadcast %114 : vector<1x256xi1> to vector<16x256xi1>
    %116 = vector.broadcast %113 : bf16 to vector<16x256xbf16>
    %117 = arith.select %115, %112, %116 : vector<16x256xi1>, vector<16x256xbf16>
    %c0_62 = arith.constant 0 : index
    %c128_63 = arith.constant 128 : index
    %118 = vector.load %arg7[%c0_62, %c128_63] : memref<16x512xbf16, #tpu.memory_space<vmem>>, vector<16x256xbf16>
    %c0_64 = arith.constant 0 : index
    %c129_65 = arith.constant 129 : index
    %119 = vector.load %arg7[%c0_64, %c129_65] : memref<16x512xbf16, #tpu.memory_space<vmem>>, vector<16x256xbf16>
    %cst_66 = arith.constant 0.000000e+00 : f32
    %120 = arith.truncf %cst_66 : f32 to bf16
    %121 = vector.shape_cast %20 : vector<1x256xi1> to vector<1x256xi1>
    %122 = vector.broadcast %121 : vector<1x256xi1> to vector<16x256xi1>
    %123 = vector.broadcast %120 : bf16 to vector<16x256xbf16>
    %124 = arith.select %122, %119, %123 : vector<16x256xi1>, vector<16x256xbf16>
    %c0_67 = arith.constant 0 : index
    %c143_68 = arith.constant 143 : index
    %125 = vector.load %arg7[%c0_67, %c143_68] : memref<16x512xbf16, #tpu.memory_space<vmem>>, vector<16x256xbf16>
    %cst_69 = arith.constant 0.000000e+00 : f32
    %126 = arith.truncf %cst_69 : f32 to bf16
    %127 = vector.shape_cast %18 : vector<1x256xi1> to vector<1x256xi1>
    %128 = vector.broadcast %127 : vector<1x256xi1> to vector<16x256xi1>
    %129 = vector.broadcast %126 : bf16 to vector<16x256xbf16>
    %130 = arith.select %128, %125, %129 : vector<16x256xi1>, vector<16x256xbf16>
    %c0_70 = arith.constant 0 : index
    %c144_71 = arith.constant 144 : index
    %131 = vector.load %arg7[%c0_70, %c144_71] : memref<16x512xbf16, #tpu.memory_space<vmem>>, vector<16x256xbf16>
    %c0_72 = arith.constant 0 : index
    %c145_73 = arith.constant 145 : index
    %132 = vector.load %arg7[%c0_72, %c145_73] : memref<16x512xbf16, #tpu.memory_space<vmem>>, vector<16x256xbf16>
    %cst_74 = arith.constant 0.000000e+00 : f32
    %133 = arith.truncf %cst_74 : f32 to bf16
    %134 = vector.shape_cast %20 : vector<1x256xi1> to vector<1x256xi1>
    %135 = vector.broadcast %134 : vector<1x256xi1> to vector<16x256xi1>
    %136 = vector.broadcast %133 : bf16 to vector<16x256xbf16>
    %137 = arith.select %135, %132, %136 : vector<16x256xi1>, vector<16x256xbf16>
    %138 = tpu.concatenate %104, %105, %111, %117, %118, %124, %130, %131, %137 in 0 : vector<16x256xbf16>, vector<16x256xbf16>, vector<16x256xbf16>, vector<16x256xbf16>, vector<16x256xbf16>, vector<16x256xbf16>, vector<16x256xbf16>, vector<16x256xbf16>, vector<16x256xbf16> -> vector<144x256xbf16>
    %c0_75 = arith.constant 0 : index
    %c0_76 = arith.constant 0 : index
    %139 = vector.load %arg4[%c0_75, %c0_76] : memref<32x144xbf16, #tpu.memory_space<vmem>>, vector<32x144xbf16>
    %cst_77 = arith.constant dense<0.000000e+00> : vector<32x256xf32>
    %140 = tpu.matmul %139, %138, %cst_77 {dimension_numbers = #tpu.dot_dimension_numbers<[1], [0], [0], [1], [0, 0, 1, 1], [], []>} : vector<32x144xbf16>, vector<144x256xbf16>, vector<32x256xf32> -> vector<32x256xf32>
    %c0_78 = arith.constant 0 : index
    %c0_79 = arith.constant 0 : index
    %141 = vector.load %arg5[%c0_78, %c0_79] : memref<32x1xf32, #tpu.memory_space<vmem>>, vector<32x1xf32>
    %142 = vector.broadcast %141 : vector<32x1xf32> to vector<32x256xf32>
    %143 = arith.addf %140, %142 : vector<32x256xf32>
    %cst_80 = arith.constant 0.000000e+00 : f32
    %144 = vector.broadcast %cst_80 : f32 to vector<32x256xf32>
    %145 = arith.maximumf %143, %144 : vector<32x256xf32>
    %146 = arith.addf %145, %88 : vector<32x256xf32>
    %c1_81 = arith.constant 1 : index
    %c0_82 = arith.constant 0 : index
    %c0_83 = arith.constant 0 : index
    %147 = vector.load %arg6[%c1_81, %c0_82, %c0_83] : memref<2x32x256xf32, #tpu.memory_space<vmem>>, vector<1x32x256xf32>
    %148 = vector.shape_cast %147 : vector<1x32x256xf32> to vector<32x256xf32>
    %149 = vector.shape_cast %146 : vector<32x256xf32> to vector<1x32x256xf32>
    tpu.vector_store %arg6[%c1_81, %c0_82, %c0_83], %149 {strides = array<i32>} : memref<2x32x256xf32, #tpu.memory_space<vmem>>, vector<1x32x256xf32>,
    return
  }
  func.func @transform_0(%arg0: i32) -> (i32, i32, i32) {
    %c0_i32 = arith.constant 0 : i32
    %c0_i32_0 = arith.constant 0 : i32
    %c0_i32_1 = arith.constant 0 : i32
    return %arg0, %c0_i32, %c0_i32_0 : i32, i32, i32
  }
  func.func @transform_1(%arg0: i32) -> (i32, i32) {
    %c0_i32 = arith.constant 0 : i32
    %c0_i32_0 = arith.constant 0 : i32
    %c0_i32_1 = arith.constant 0 : i32
    return %c0_i32, %c0_i32_0 : i32, i32
  }
  func.func @transform_2(%arg0: i32) -> (i32, i32) {
    %c0_i32 = arith.constant 0 : i32
    %c0_i32_0 = arith.constant 0 : i32
    %c0_i32_1 = arith.constant 0 : i32
    return %c0_i32, %c0_i32_0 : i32, i32
  }
  func.func @transform_3(%arg0: i32) -> (i32, i32) {
    %c0_i32 = arith.constant 0 : i32
    %c0_i32_0 = arith.constant 0 : i32
    %c0_i32_1 = arith.constant 0 : i32
    return %c0_i32, %c0_i32_0 : i32, i32
  }
  func.func @transform_4(%arg0: i32) -> (i32, i32) {
    %c0_i32 = arith.constant 0 : i32
    %c0_i32_0 = arith.constant 0 : i32
    %c0_i32_1 = arith.constant 0 : i32
    return %c0_i32, %c0_i32_0 : i32, i32
  }
  func.func @transform_5(%arg0: i32) -> (i32, i32, i32) {
    %c0_i32 = arith.constant 0 : i32
    %c0_i32_0 = arith.constant 0 : i32
    %c0_i32_1 = arith.constant 0 : i32
    return %arg0, %c0_i32, %c0_i32_0 : i32, i32, i32
  }
}

</mosaic_0001>

<bundles_post_ra>
// kernel: tpu_custom_call.1
= control target key start
LH: loop header
LB: loop body
LE: loop exit
PB: predicated region body
PF: predicated region fallthrough
CT: control target
= control target key end

     0   :  { %10 = vsyncpa [#allocation4], 0  ;;  %s2800_s0 = inlined_call_operand.hbm [shape: f32[4,32,256], index: 0, kind: input, shape index: {}]   ;;  %s2801_s1 = inlined_call_operand.vmem [shape: bf16[16,32], index: 1, kind: input, shape index: {}]   ;;  %s2802_s2 = inlined_call_operand.vmem [shape: f32[16,1], index: 2, kind: input, shape index: {}]   ;;  %s2803_s3 = inlined_call_operand.vmem [shape: bf16[32,144], index: 3, kind: input, shape index: {}]   ;;  %s2804_s4 = inlined_call_operand.vmem [shape: f32[32,1], index: 4, kind: input, shape index: {}]   ;;  %s2805_s5 = inlined_call_operand.hbm [shape: f32[4,32,256], index: 5, kind: output, shape index: {}]  }
   0x1   :  { %12 = vsyncpa [#allocation4 + $0x1], 0 }
   0x2   :  { %13 = vsyncpa [#allocation5], 0 }
   0x3   :  { %15 = vsyncpa [#allocation5 + $0x1], 0  ;;  %s1955_s18 = smov 0   ;;  %s1957_s19 = smov 0  }
   0x4   :  { %s1959_s20 = smov 0   ;;  %s1961_s21 = smov 0  }
   0x5 LB: > { %s1976_s22 = sadd.s32 4294967295, %s1906_s21   ;;  %s1550_s23 = sadd.s32 4294967294, %s1906_s21   ;;  %s1906_s21 = sphi %s1961_s21, %s2845_s21   ;;  %s1902_s20 = sphi %s1959_s20, %s2844_s20   ;;  %s1898_s19 = sphi %s1957_s19, %s2843_s19   ;;  %s1894_s18 = sphi %s1955_s18, %s2842_s18  }
   0x6   : > { %s1980_s24 = sadd.s32 1, %s1906_s21   ;;  %s28_s25 = sadd.s32 1, %s1902_s20 }
   0x7   : > { %s25_s26 = ssub.s32 %s1906_s21, %s1980_s24  ;;  %p35_p0 = scmp.ne.s32.totalorder %s1902_s20, %s1898_s19 }
   0x8   : > { %p26_p1 = scmp.eq.s32.totalorder %s25_s26, 0  ;;  %p36_p2 = scmp.eq.s32.totalorder %s1906_s21, 0 }
   0x9   : > { %p41_p3 = scmp.ne.s32.totalorder %s1898_s19, %s1894_s18  ;;  %p42_p4 = scmp.eq.s32.totalorder %s1976_s22, 0 }
   0xa   : > { %s1992_s27 = scalar_select %p26_p1, %s1902_s20, %s28_s25  }
   0xb   : > { %p1994_p5 = por %p36_p2, %p35_p0  ;;  %p1998_p6 = por %p42_p4, %p41_p3 }
   0xc   : > { %p149_p7 = scmp.eq.s32.totalorder %s1976_s22, 1  ;;  %p155_p8 = scmp.eq.s32.totalorder %s1550_s23, 1 }
   0xd   : > { %p1740_p10 = scmp.lt.s32.totalorder %s1906_s21, 2  ;;  %s187_s7 = sand.u32 1, %s1902_s20  }
   0xe   : > { %p2005_p11 = por %p149_p7, %p35_p0  ;;  %p2009_p12 = por %p155_p8, %p41_p3 }
   0xf   : > { %s1699_s8 = sshll.u32 %s1906_s21, 7  ;;  %s1553_s9 = sshll.u32 %s187_s7, 7 }
  0x10   : > { %s197_s12 = scalar_lea.hbm %s2800_s0, %s1699_s8  ;;  %s191_s14 = scalar_lea.vmem [#allocation3], %s1553_s9 }
  0x11   : > { %s198_s13 = sshll.u32 %s197_s12, 4  ;;  %s200_s15 = sshll.u32 %s191_s14, 4  ;;  %s199_s13 = int_to_ptr.hbm [resolvable:$true] %s198_s13  ;;  %s201_s15 = int_to_ptr.vmem [resolvable:$true] %s200_s15 }
  0x12   : > { %p2020_p13 = pnand %p1740_p10, %p1994_p5  ;;  %p1557_p0 = scmp.ge.s32.totalorder %s1906_s21, 1 }
  0x13   : > { %p208_p1 = scmp.lt.s32.totalorder %s1906_s21, 3  ;;  %s188_s17 = scalar_lea.sflag [#allocation4], %s187_s7 }
  0x14   : > { %s1810_s23 = sshra.s32 %s199_s13, 4  ;;  %p1814_p3 = pneg %p2020_p13  ;;  %s1811_s23 = int_to_ptr.hbm [resolvable:$true] %s1810_s23 }
  0x15   : > { %s1812_s25 = scalar_lea.hbm %s1811_s23, 128  ;;  %s1817_s28 = scalar_lea.hbm %s2800_s0, 256 }
  0x16   : > { %p1813_p2 = scmp.ne.s32.totalorder %s1811_s23, %s1812_s25  ;;  %p1818_p5 = scmp.lt.s32.totalorder %s1811_s23, %s2800_s0 }
  0x17   : > { %p1819_p8 = scmp.lt.s32.totalorder %s1817_s28, %s1812_s25 }
  0x18   : > { %p1815_p4 = pnand %p1814_p3, %p1813_p2 }
  0x19   : > { %p1820_p10 = por %p1819_p8, %p1818_p5 }
  0x1a   : > { %p1816_p7 = pneg %p1815_p4 }
  0x1c   : > { %p1821_p9 = pnand %p1820_p10, %p1816_p7 }
  0x1e   : > { %1824 = shalt.err (!%p1821_p9)
}
  0x1f   : > { %s1908_s7 = smov 256   ;;  %s1909_s11 = smov 16  }
  0x20   : > { %1735 = dma.hbm_to_vmem [thread:$0]  (!%p2020_p13), %s199_s13, 2048, %s201_s15, %s188_s17, %s1908_s7, %s1908_s7, %s1909_s11  }
  0x21   : > { %p209_p2 = pnand %p1557_p0, %p208_p1 }
  0x22   : > { %s2041_s12 = sand.u32 (!%p209_p2), 1, %s1898_s19  }
  0x23   : > { %212 = sbr.rel (%p209_p2) target bundleno = 741 (0x2e5), region = 40  ;;  %s1558_s14 = sshll.u32 (!%p209_p2), %s2041_s12, 7 }
  0x24   : > { %s215_s23 = scalar_lea.sflag (!%p209_p2), [#allocation4], %s2041_s12  ;;  %s2047_s25 = scalar_lea.vmem (!%p209_p2), [#allocation3], %s1558_s14 }
  0x28   : > { %1885 = dma.done.wait (%p1998_p6), %s215_s23, 2048  }
  0x29   : > { %1887 = vsyncadd (%p1998_p6), %s215_s23, 4294965248  ;;  %v251_v0 = vlaneseq  ;;  %v1910_v1 = vmov 0   ;;  %v300_v6 = vld [vmem:[%s2802_s2] sm:$0xff]  ;;  %v292_v8 = vld [vmem:[%s2047_s25 + $0x30] sm:$0xff]  ;;  %s1911_s15 = smov 111   ;;  %s1912_s26 = smov 127  }
  0x2a   : > { %1791 = vset.pattern.permute.xlu0 %v1910_v1  ;;  %282 = vst [vmem:[#allocation2] sm:$0xf] %v1910_v1  ;;  %1792 = vset.pattern.permute.xlu1 %v1910_v1  ;;  %v290_v7 = vld [vmem:[%s2047_s25 + $0x20] sm:$0xff]  ;;  %v291_v11 = vld [vmem:[%s2047_s25 + $0x28] sm:$0xff]  ;;  %v293_v12 = vld [vmem:[%s2047_s25 + $0x38] sm:$0xff]  ;;  %vm317_vm5 = vcmask 261120   ;;  %v2121_v47 = vunpack.c.l.b16 %v1910_v1  ;;  %v2124_v48 = vunpack.c.h.b16 %v1910_v1 }
  0x2b   : > { %283 = vst [vmem:[#allocation2 + $0x10] sm:$0xf] %v1910_v1  ;;  %v252_v2 = vand.u32 127, %v251_v0  ;;  %1793 = vset.pattern.permute.xlu2 %v1910_v1  ;;  %304 = vperm.xlu0 %1791, %v300_v6   ;;  %v298_v10 = vpack.c.bf16 %v292_v8, %v290_v7  ;;  %v286_v13 = vld [vmem:[%s2047_s25] sm:$0xff]  ;;  %v299_v14 = vpack.c.bf16 %v293_v12, %v291_v11  ;;  %v288_v15 = vld [vmem:[%s2047_s25 + $0x10] sm:$0xff]  ;;  %v287_v16 = vld [vmem:[%s2047_s25 + $0x8] sm:$0xff] }
  0x2c   : > { %284 = vst [vmem:[#allocation2 + $0xc] sm:$0xf] %v1910_v1  ;;  %v289_v17 = vld [vmem:[%s2047_s25 + $0x18] sm:$0xff]  ;;  %v296_v18 = vpack.c.bf16 %v288_v15, %v286_v13  ;;  %v1622_v23 = vld [vmem:[%s2047_s25 + $0x60] sm:$0xff]  ;;  %v1624_v24 = vld [vmem:[%s2047_s25 + $0x70] sm:$0xff]  ;;  %s1913_s9 = smov 113  }
  0x2d   : > { %285 = vst [vmem:[#allocation2 + $0x1c] sm:$0xf] %v1910_v1  ;;  %v253_v3 = vadd.s32 128, %v252_v2  ;;  %v258_v4 = vand.u32 15, %v252_v2  ;;  %327 = vmatpush.bf16.msra.mxu0 %v298_v10  ;;  %341 = vmatpush.bf16.msra.mxu1 %v299_v14  ;;  %v297_v19 = vpack.c.bf16 %v289_v17, %v287_v16  ;;  %v301_v25 = vld [vmem:[%s2802_s2 + $0x8] sm:$0xff]  ;;  %v952_v26 = vpack.c.bf16 %v1624_v24, %v1622_v23  ;;  %v1700_v27 = vld [vmem:[%s2801_s1] sm:$0xff] }
  0x2e   : > { %v1618_v28 = vld [vmem:[%s2047_s25 + $0x40] sm:$0xff]  ;;  %v1620_v29 = vld [vmem:[%s2047_s25 + $0x50] sm:$0xff]  ;;  %v1623_v30 = vld [vmem:[%s2047_s25 + $0x68] sm:$0xff]  ;;  %s1914_s10 = smov 1   ;;  %s1915_s7 = smov 15   ;;  %vm422_vm7 = vcmask 1039360  }
  0x2f   : > { %v265_v5 = vand.u32 15, %v253_v3  ;;  %vm2065_vm0 = vcmp.ge.s32.totalorder %v258_v4, 1  ;;  %vm2078_vm3 = vcmp.le.s32.totalorder %v258_v4, 14  ;;  %v1625_v31 = vld [vmem:[%s2047_s25 + $0x78] sm:$0xff]  ;;  %v950_v32 = vpack.c.bf16 %v1620_v29, %v1618_v28  ;;  %v1619_v35 = vld [vmem:[%s2047_s25 + $0x48] sm:$0xff]  ;;  %s1916_s11 = smov 17  }
  0x30   : > { %v953_v34 = vpack.c.bf16 %v1625_v31, %v1623_v30  ;;  %v1621_v36 = vld [vmem:[%s2047_s25 + $0x58] sm:$0xff]  ;;  %v1713_v38 = vld [vmem:[%s2801_s1] sm:$0xff]  ;;  %s1917_s13 = smov 95   ;;  %vm451_vm14 = vcmask 7168   ;;  %s1918_s8 = smov 110  }
  0x31   : > { %vm279_vm1 = vcmp.ge.s32.totalorder %v265_v5, 1  ;;  %vm2082_vm4 = vcmp.le.s32.totalorder %v265_v5, 14  ;;  %328 = vmatpush.bf16.msra.mxu0 %v296_v18  ;;  %342 = vmatpush.bf16.msra.mxu1 %v297_v19  ;;  %v951_v37 = vpack.c.bf16 %v1621_v36, %v1619_v35  ;;  %v700_v42 = vld [vmem:[%s2804_s4] sm:$0xff]  ;;  %s1919_s28 = smov 96   ;;  %s1461_s17 = scalar_lea.sflag [#allocation5], %s2041_s12 }
  0x32   : > { %vm365_vm2 = vmpackc.low %vm279_vm1, %vm2065_vm0  ;;  %v1634_v43 = vld [vmem:[#allocation2] sm:$0xf]  ;;  %v1715_v44 = vld [vmem:[#allocation2 + $0xc] sm:$0xf0] }
  0x33   : > { %v366_v20 = vsel %vm365_vm2, 65537, %v1910_v1  ;;  %vm394_vm6 = vmpackc.low %vm2082_vm4, %vm2078_vm3  ;;  %309 = vperm.xlu0 %1791, %v301_v25   ;;  %v1596_v39 = vld [vmem:[#allocation2 + $0xc] sm:$0xf]  ;;  %v1635_v45 = vor.u32 %v1715_v44, %v1634_v43  ;;  %v1568_v8 = vld [vmem:[#allocation2] sm:$0xf] }
  0x34   : > { %367 = vrot.lane.b32.xlu1 %v366_v20, %s1911_s15  ;;  %419 = vrot.lane.b32.xlu2 %v366_v20, %s1912_s26  ;;  %v395_v33 = vsel %vm394_vm6, 65537, %v1910_v1  ;;  %v1708_v40 = vld [vmem:[#allocation2 + $0x18] sm:$0xf0]  ;;  %v1662_v57 = vld [vmem:[#allocation2 + $0xc] sm:$0xf] }
  0x35   : > { %980 = vmatpush.bf16.msrb.mxu1 %v952_v26  ;;  %1564 = vmatmul.msk.bf16.vlgmr.msra.gmra.mxu0 %vm317_vm5, %v1700_v27  ;;  %v1597_v41 = vor.u32 %v1708_v40, %v1596_v39  ;;  %v1721_v58 = vld [vmem:[#allocation2 + $0x18] sm:$0xf0]  ;;  %v2140_v3 = vld [vmem:[#allocation2 + $0xc] sm:$0xf]  ;;  %v1702_v9 = vld [vmem:[#allocation2 + $0xc] sm:$0xf0] }
  0x36   : > { %1565 = vmatmul.msk.bf16.vlgmr.msra.gmra.mxu1 %vm317_vm5, %v1700_v27  ;;  %v1663_v59 = vor.u32 %v1721_v58, %v1662_v57  ;;  %v2142_v4 = vld [vmem:[#allocation2 + $0x1c] sm:$0xf]  ;;  %v2146_v5 = vld [vmem:[#allocation2 + $0xc] sm:$0xf]  ;;  %v1569_v17 = vor.u32 %v1702_v9, %v1568_v8 }
  0x39   : > { %981 = vmatpush.bf16.msrb.mxu1 %v950_v32 }
  0x3b   : > { %471 = vrot.lane.b32.xlu0 %v366_v20, %s1915_s7  ;;  %s1922_s7 = smov 112  }
  0x3c   : > { %396 = vrot.lane.b32.xlu1 %v395_v33, %s1913_s9  ;;  %448 = vrot.lane.b32.xlu2 %v395_v33, %s1914_s10  ;;  %s1920_s9 = smov 94   ;;  %s1921_s10 = smov 126  }
  0x3d   : > { %994 = vmatpush.bf16.msra.mxu1 %v953_v34 }
  0x41   : > { %995 = vmatpush.bf16.msra.mxu1 %v951_v37 }
  0x43   : > { %958 = vperm.xlu0 %1791, %v300_v6   ;;  %v2148_v6 = vld [vmem:[#allocation2 + $0x1c] sm:$0xf] }
  0x44   : > { %494 = vrot.lane.b32.xlu1 %v395_v33, %s1916_s11  ;;  %543 = vrot.lane.b32.xlu2 %v1569_v17, %s1912_s26 }
  0x46   : > { %1630 = vmatmul.msk.bf16.vlgmr.msrb.gmra.mxu1 %vm317_vm5, %v1713_v38 }
  0x4b   : > { %669 = vrot.lane.b32.xlu0 %v1597_v41, %s1917_s13 }
  0x4c   : > { %963 = vperm.xlu1 %1792, %v301_v25  }
  0x53   : > { %706 = vperm.xlu0 %1791, %v700_v42  }
  0x54   : > { %1070 = vrot.lane.b32.xlu1 %v1635_v45, %s1912_s26 }
  0x56   : > { %1631 = vmatmul.msk.bf16.vlgmr.msra.gmra.mxu1 %vm317_vm5, %v1713_v38  ;;  %vm370_vm5 = vcmask 908288  }
  0x5b   : > { %1192 = vrot.lane.b32.xlu0 %v1663_v59, %s1917_s13 }
  0x8e   : > { %v420_v46 = vpop.permute.xlu2 %419 }
  0x8f   : > { %v421_v49 = vrot.slane %v420_v46, 4 }
  0x91   : > { %v423_v50 = vsel %vm422_vm7, %v421_v49, %v420_v46  ;;  %v431_v51 = vunpack.c.l.b16 %v421_v49  ;;  %v432_v52 = vunpack.c.h.b16 %v421_v49 }
  0x92   : > { %v424_v53 = vunpack.c.l.b16 %v423_v50  ;;  %v425_v54 = vunpack.c.h.b16 %v423_v50 }
  0x93   : > { %vm435_vm8 = vcmp.ne.s32.totalorder %v431_v51, %v2121_v47  ;;  %vm436_vm9 = vcmp.ne.s32.totalorder %v432_v52, %v2124_v48 }
  0x94   : > { %vm428_vm10 = vcmp.ne.s32.totalorder %v424_v53, %v2121_v47  ;;  %vm429_vm11 = vcmp.ne.s32.totalorder %v425_v54, %v2124_v48  ;;  %vm2131_vm12 = vmpackc.low %vm436_vm9, %vm435_vm8 }
  0x95   : > { %vm2135_vm13 = vmpackc.low %vm429_vm11, %vm428_vm10 }
  0x96   : > { %v449_v60 = vpop.permute.xlu2 %448 }
  0x97   : > { %v450_v61 = vrot.slane %v449_v60, 4 }
  0x99   : > { %v452_v62 = vsel %vm451_vm14, %v450_v61, %v449_v60  ;;  %v460_v63 = vunpack.c.l.b16 %v450_v61  ;;  %v461_v0 = vunpack.c.h.b16 %v450_v61 }
  0x9a   : > { %v453_v1 = vunpack.c.l.b16 %v452_v62  ;;  %v454_v2 = vunpack.c.h.b16 %v452_v62 }
  0x9b   : > { %vm464_vm15 = vcmp.ne.s32.totalorder %v460_v63, %v2121_v47  ;;  %vm465_vm0 = vcmp.ne.s32.totalorder %v461_v0, %v2124_v48 }
  0x9c   : > { %vm457_vm1 = vcmp.ne.s32.totalorder %v453_v1, %v2121_v47  ;;  %vm458_vm2 = vcmp.ne.s32.totalorder %v454_v2, %v2124_v48  ;;  %vm2152_vm3 = vmpackc.low %vm465_vm0, %vm464_vm15  ;;  %vm474_vm15 = vcmask 121856   ;;  %vm497_vm0 = vcmask 138240  }
  0x9d   : > { %vm2156_vm4 = vmpackc.low %vm458_vm2, %vm457_vm1  ;;  %v468_v11 = vsel %vm2152_vm3, %v2140_v3, 0  ;;  %v470_v12 = vsel %vm2152_vm3, %v2142_v4, 0  ;;  %v1033_v15 = vsel %vm2152_vm3, %v2146_v5, 0  ;;  %v1035_v16 = vsel %vm2152_vm3, %v2148_v6, 0  ;;  %v305_v19 = vpop.permute.xlu0 %304 }
  0x9e   : > { %v614_v13 = vunpack.c.l.b16 %v468_v11  ;;  %v617_v14 = vunpack.c.l.b16 %v470_v12  ;;  %v1139_v20 = vunpack.c.l.b16 %v1033_v15  ;;  %v1142_v21 = vunpack.c.l.b16 %v1035_v16 }
  0xa0   : > { %v620_v18 = vpack.c.b16 %v617_v14, %v614_v13  ;;  %v1145_v24 = vpack.c.b16 %v1142_v21, %v1139_v20 }
  0xa2   : > { %625 = vrot.lane.b32.xlu1 %v620_v18, %s1918_s8 }
  0xa5   : > { %v2175_v30 = vpop.permute.xlu0 %309 }
  0xa6   : > { %v368_v22 = vpop.permute.xlu1 %367 }
  0xa7   : > { %v369_v23 = vrot.slane %v368_v22, 4 }
  0xa9   : > { %v371_v25 = vsel %vm370_vm5, %v369_v23, %v368_v22  ;;  %v379_v26 = vunpack.c.l.b16 %v369_v23  ;;  %v380_v27 = vunpack.c.h.b16 %v369_v23 }
  0xaa   : > { %v372_v28 = vunpack.c.l.b16 %v371_v25  ;;  %v373_v29 = vunpack.c.h.b16 %v371_v25  ;;  %1150 = vrot.lane.b32.xlu1 %v1145_v24, %s1918_s8 }
  0xab   : > { %vm383_vm6 = vcmp.ne.s32.totalorder %v379_v26, %v2121_v47  ;;  %vm384_vm8 = vcmp.ne.s32.totalorder %v380_v27, %v2124_v48 }
  0xac   : > { %vm376_vm9 = vcmp.ne.s32.totalorder %v372_v28, %v2121_v47  ;;  %vm377_vm10 = vcmp.ne.s32.totalorder %v373_v29, %v2124_v48  ;;  %vm2182_vm11 = vmpackc.low %vm384_vm8, %vm383_vm6 }
  0xad   : > { %vm2186_vm14 = vmpackc.low %vm377_vm10, %vm376_vm9  ;;  %v472_v34 = vpop.permute.xlu0 %471 }
  0xae   : > { %v2190_v33 = vpop.permute.xlu1 %396  ;;  %v473_v35 = vrot.slane %v472_v34, 4 }
  0xaf   : > { %v398_v12 = vrot.slane %v2190_v33, 4 }
  0xb0   : > { %v475_v36 = vsel %vm474_vm15, %v473_v35, %v472_v34  ;;  %v483_v37 = vunpack.c.l.b16 %v473_v35  ;;  %v484_v38 = vunpack.c.h.b16 %v473_v35 }
  0xb1   : > { %v476_v39 = vunpack.c.l.b16 %v475_v36  ;;  %v477_v40 = vunpack.c.h.b16 %v475_v36  ;;  %v408_v46 = vunpack.c.l.b16 %v398_v12 }
  0xb2   : > { %v330_v41 = vpop.f32.mrf.mxu0  ;;  %vm487_vm1 = vcmp.ne.s32.totalorder %v483_v37, %v2121_v47  ;;  %vm488_vm2 = vcmp.ne.s32.totalorder %v484_v38, %v2124_v48 }
  0xb3   : > { %v331_v43 = vadd.f32 %v330_v41, %v305_v19  ;;  %v344_v44 = vpop.f32.mrf.mxu1  ;;  %vm480_vm3 = vcmp.ne.s32.totalorder %v476_v39, %v2121_v47  ;;  %vm481_vm6 = vcmp.ne.s32.totalorder %v477_v40, %v2124_v48  ;;  %vm2196_vm8 = vmpackc.low %vm488_vm2, %vm487_vm1 }
  0xb4   : > { %v345_v49 = vadd.f32 %v344_v44, %v305_v19  ;;  %vm2200_vm9 = vmpackc.low %vm481_vm6, %vm480_vm3  ;;  %v491_v60 = vsel %vm2196_vm8, %v2140_v3, 0  ;;  %v493_v61 = vsel %vm2196_vm8, %v2142_v4, 0  ;;  %v1037_v7 = vsel %vm2196_vm8, %v2146_v5, 0 }
  0xb5   : > { %v349_v51 = vmax.f32 %v331_v43, 0.0  ;;  %v636_v62 = vunpack.c.l.b16 %v491_v60  ;;  %v639_v1 = vunpack.c.l.b16 %v493_v61  ;;  %v1039_v8 = vsel %vm2196_vm8, %v2148_v6, 0  ;;  %v959_v61 = vpop.permute.xlu0 %958 }
  0xb6   : > { %v495_v42 = vpop.permute.xlu1 %494  ;;  %v350_v57 = vmax.f32 %v345_v49, 0.0  ;;  %v1160_v15 = vunpack.c.l.b16 %v1037_v7  ;;  %v1163_v21 = vunpack.c.l.b16 %v1039_v8  ;;  %vm399_vm8 = vcmask 924672  }
  0xb7   : > { %v496_v45 = vrot.slane %v495_v42, 4  ;;  %v642_v14 = vpack.c.b16 %v639_v1, %v636_v62  ;;  %v409_v49 = vunpack.c.h.b16 %v398_v12 }
  0xb8   : > { %v2213_v63 = vpack.c.bf16 %v350_v57, %v349_v51 }
  0xb9   : > { %v498_v52 = vsel %vm497_vm0, %v496_v45, %v495_v42  ;;  %v506_v53 = vunpack.c.l.b16 %v496_v45  ;;  %v507_v54 = vunpack.c.h.b16 %v496_v45  ;;  %647 = vrot.lane.b32.xlu0 %v642_v14, %s1919_s28 }
  0xba   : > { %v499_v58 = vunpack.c.l.b16 %v498_v52  ;;  %v500_v59 = vunpack.c.h.b16 %v498_v52  ;;  %355 = vst [vmem:[#allocation2 + $0x4] sm:$0xff] %v2213_v63  ;;  %v332_v13 = vpop.f32.mrf.mxu0 }
  0xbb   : > { %vm510_vm10 = vcmp.ne.s32.totalorder %v506_v53, %v2121_v47  ;;  %vm511_vm15 = vcmp.ne.s32.totalorder %v507_v54, %v2124_v48  ;;  %v333_v17 = vadd.f32 %v332_v13, %v2175_v30  ;;  %v346_v18 = vpop.f32.mrf.mxu1 }
  0xbc   : > { %vm503_vm1 = vcmp.ne.s32.totalorder %v499_v58, %v2121_v47  ;;  %vm504_vm2 = vcmp.ne.s32.totalorder %v500_v59, %v2124_v48  ;;  %vm2217_vm3 = vmpackc.low %vm511_vm15, %vm510_vm10  ;;  %v347_v20 = vadd.f32 %v346_v18, %v2175_v30 }
  0xbd   : > { %vm2221_vm6 = vmpackc.low %vm504_vm2, %vm503_vm1  ;;  %v1041_v9 = vsel %vm2217_vm3, %v2146_v5, 0  ;;  %v1043_v11 = vsel %vm2217_vm3, %v2148_v6, 0  ;;  %v514_v5 = vsel %vm2217_vm3, %v2140_v3, 0  ;;  %v516_v6 = vsel %vm2217_vm3, %v2142_v4, 0 }
  0xbe   : > { %v1202_v16 = vunpack.c.l.b16 %v1041_v9  ;;  %v1205_v19 = vunpack.c.l.b16 %v1043_v11  ;;  %v680_v22 = vunpack.c.l.b16 %v514_v5  ;;  %v683_v23 = vunpack.c.l.b16 %v516_v6 }
  0xbf   : > { %v351_v24 = vmax.f32 %v333_v17, 0.0  ;;  %v352_v26 = vmax.f32 %v347_v20, 0.0  ;;  %v400_v3 = vsel %vm399_vm8, %v398_v12, %v2190_v33  ;;  %v1166_v4 = vpack.c.b16 %v1163_v21, %v1160_v15  ;;  %v964_v15 = vpop.permute.xlu1 %963 }
  0xc0   : > { %v1208_v25 = vpack.c.b16 %v1205_v19, %v1202_v16  ;;  %v686_v27 = vpack.c.b16 %v683_v23, %v680_v22  ;;  %v401_v29 = vunpack.c.l.b16 %v400_v3  ;;  %v402_v30 = vunpack.c.h.b16 %v400_v3 }
  0xc1   : > { %v2250_v28 = vpack.c.bf16 %v352_v26, %v351_v24  ;;  %1171 = vrot.lane.b32.xlu0 %v1166_v4, %s1919_s28  ;;  %v1701_v35 = vld [vmem:[#allocation2 + $0x4] sm:$0xf]  ;;  %v1576_v36 = vld [vmem:[#allocation2 + $0x8] sm:$0xf]  ;;  %vm412_vm2 = vcmp.ne.s32.totalorder %v408_v46, %v2121_v47  ;;  %vm413_vm3 = vcmp.ne.s32.totalorder %v409_v49, %v2124_v48 }
  0xc2   : > { %1213 = vrot.lane.b32.xlu1 %v1208_v25, %s1920_s9  ;;  %691 = vrot.lane.b32.xlu2 %v686_v27, %s1920_s9  ;;  %vm405_vm10 = vcmp.ne.s32.totalorder %v401_v29, %v2121_v47  ;;  %vm406_vm15 = vcmp.ne.s32.totalorder %v402_v30, %v2124_v48  ;;  %v1580_v37 = vld [vmem:[#allocation2 + $0x4] sm:$0xf]  ;;  %vm2284_vm8 = vmpackc.low %vm413_vm3, %vm412_vm2  ;;  %v1704_v8 = vld [vmem:[#allocation2 + $0x8] sm:$0xf] }
  0xc3   : > { %356 = vst [vmem:[#allocation2 + $0x14] sm:$0xff] %v2250_v28  ;;  %v983_v34 = vpop.f32.mrf.mxu1  ;;  %vm2257_vm1 = vmpackc.low %vm406_vm15, %vm405_vm10  ;;  %v2261_v44 = vld [vmem:[#allocation2] sm:$0xff]  ;;  %v2288_v11 = vld [vmem:[#allocation2 + $0x8] sm:$0xf] }
  0xc4   : > { %v2276_v53 = vsel %vm2257_vm1, %v2261_v44, 0  ;;  %v1588_v62 = vld [vmem:[#allocation2 + $0x4] sm:$0xf]  ;;  %v984_v1 = vadd.f32 %v983_v34, %v959_v61  ;;  %v416_v16 = vsel %vm2284_vm8, %v2288_v11, 0  ;;  %v438_v17 = vsel %vm2135_vm13, %v2261_v44, 0 }
  0xc5   : > { %v556_v59 = vunpack.c.h.b16 %v2276_v53  ;;  %v557_v22 = vunpack.c.l.b16 %v416_v16  ;;  %v578_v24 = vunpack.c.h.b16 %v438_v17  ;;  %v1706_v25 = vld [vmem:[#allocation2 + $0x8] sm:$0xf]  ;;  %v469_v34 = vsel %vm2156_vm4, %v2250_v28, 0 }
  0xc6   : > { %v1002_v18 = vmax.f32 %v984_v1, 0.0 }
  0xca   : > { %v1570_v33 = vld [vmem:[#allocation2 + $0x10] sm:$0xf0]  ;;  %v1703_v38 = vld [vmem:[#allocation2 + $0x14] sm:$0xf0] }
  0xcb   : > { %v1705_v39 = vld [vmem:[#allocation2 + $0x10] sm:$0xf0]  ;;  %v1573_v41 = vor.u32 %v1701_v35, %v1570_v33  ;;  %v1577_v42 = vor.u32 %v1703_v38, %v1576_v36  ;;  %v985_v51 = vpop.f32.mrf.mxu1  ;;  %v1582_v58 = vld [vmem:[#allocation2 + $0x14] sm:$0xf0]  ;;  %v467_v33 = vsel %vm2156_vm4, %v2213_v63, 0 }
  0xcc   : > { %v1581_v43 = vor.u32 %v1705_v39, %v1580_v37  ;;  %v2263_v45 = vld [vmem:[#allocation2 + $0x10] sm:$0xff]  ;;  %v2282_v60 = vld [vmem:[#allocation2 + $0x18] sm:$0xf]  ;;  %v1585_v48 = vor.u32 %v1704_v8, %v1582_v58  ;;  %v986_v21 = vadd.f32 %v985_v51, %v964_v15  ;;  %v439_v37 = vsel %vm2131_vm12, %v2288_v11, 0 }
  0xcd   : > { %v2268_v52 = vsel %vm2257_vm1, %v2263_v45, 0  ;;  %545 = vrot.lane.b32.xlu0 %v1573_v41, %s1912_s26  ;;  %547 = vrot.lane.b32.xlu1 %v1577_v42, %s1912_s26  ;;  %v1707_v57 = vld [vmem:[#allocation2 + $0x10] sm:$0xf0]  ;;  %v418_v12 = vsel %vm2284_vm8, %v2282_v60, 0  ;;  %v2296_v13 = vsel %vm2135_vm13, %v2263_v45, 0  ;;  %v441_v30 = vsel %vm2131_vm12, %v2282_v60, 0 }
  0xce   : > { %603 = vrot.lane.b32.xlu2 %v1581_v43, %s1911_s15  ;;  %v559_v54 = vunpack.c.h.b16 %v2268_v52  ;;  %v1589_v7 = vor.u32 %v1707_v57, %v1588_v62  ;;  %v560_v5 = vunpack.c.l.b16 %v418_v12  ;;  %v581_v6 = vunpack.c.h.b16 %v2296_v13  ;;  %v1590_v23 = vld [vmem:[#allocation2 + $0x14] sm:$0xf0] }
  0xcf   : > { %v1593_v29 = vor.u32 %v1706_v25, %v1590_v23  ;;  %v1004_v35 = vmax.f32 %v986_v21, 0.0  ;;  %v582_v39 = vunpack.c.l.b16 %v441_v30  ;;  %v615_v41 = vunpack.c.l.b16 %v469_v34 }
  0xd0   : > { %v562_v9 = vpack.c.b16 %v559_v54, %v556_v59  ;;  %v563_v26 = vpack.c.b16 %v560_v5, %v557_v22  ;;  %v584_v27 = vpack.c.b16 %v581_v6, %v578_v24  ;;  %v558_v42 = vunpack.c.l.b16 %v2268_v52 }
  0xd1   : > { %v579_v46 = vunpack.c.l.b16 %v439_v37  ;;  %v612_v49 = vunpack.c.l.b16 %v467_v33  ;;  %v555_v51 = vunpack.c.l.b16 %v2276_v53  ;;  %v515_v59 = vsel %vm2221_vm6, %v2250_v28, 0 }
  0xd2   : > { %v513_v52 = vsel %vm2221_vm6, %v2213_v63, 0  ;;  %v682_v62 = vunpack.c.h.b16 %v515_v59  ;;  %v613_v1 = vunpack.c.h.b16 %v467_v33  ;;  %v388_v2 = vsel %vm2186_vm14, %v2263_v45, 0 }
  0xd3   : > { %v997_v47 = vpop.f32.mrf.mxu1  ;;  %v585_v54 = vpack.c.b16 %v582_v39, %v579_v46  ;;  %v618_v57 = vpack.c.b16 %v615_v41, %v612_v49  ;;  %v561_v58 = vpack.c.b16 %v558_v42, %v555_v51  ;;  %v678_v25 = vunpack.c.l.b16 %v513_v52 }
  0xd4   : > { %v998_v14 = vadd.f32 %v997_v47, %v959_v61  ;;  %v616_v61 = vunpack.c.h.b16 %v469_v34  ;;  %v389_v42 = vsel %vm2182_vm11, %v2282_v60, 0  ;;  %v387_v51 = vsel %vm2182_vm11, %v2288_v11, 0 }
  0xd5   : > { %665 = vrot.lane.b32.xlu1 %v1589_v7, %s1917_s13  ;;  %566 = vrot.lane.b32.xlu0 %v562_v9, %s1921_s10  ;;  %v580_v7 = vunpack.c.l.b16 %v2296_v13  ;;  %v679_v9 = vunpack.c.h.b16 %v513_v52  ;;  %v492_v13 = vsel %vm2200_vm9, %v2250_v28, 0  ;;  %v386_v28 = vsel %vm2186_vm14, %v2261_v44, 0 }
  0xd6   : > { %605 = vrot.lane.b32.xlu2 %v1585_v48, %s1911_s15  ;;  %v1003_v19 = vmax.f32 %v998_v14, 0.0  ;;  %v577_v14 = vunpack.c.l.b16 %v438_v17  ;;  %v619_v16 = vpack.c.b16 %v616_v61, %v613_v1  ;;  %v490_v17 = vsel %vm2200_vm9, %v2213_v63, 0 }
  0xd7   : > { %v637_v24 = vunpack.c.l.b16 %v492_v13  ;;  %v635_v60 = vunpack.c.h.b16 %v490_v17 }
  0xd8   : > { %v2308_v20 = vpack.c.bf16 %v1003_v19, %v1002_v18  ;;  %v685_v18 = vpack.c.b16 %v682_v62, %v679_v9  ;;  %v583_v5 = vpack.c.b16 %v580_v7, %v577_v14  ;;  %v524_v9 = vunpack.c.l.b16 %v388_v2 }
  0xda   : > { %1008 = vst [vmem:[#allocation2 + $0x4] sm:$0xff] %v2308_v20  ;;  %v1040_v3 = vsel %vm2221_vm6, %v2308_v20, 0  ;;  %v1036_v10 = vsel %vm2200_vm9, %v2308_v20, 0 }
  0xdb   : > { %v999_v4 = vpop.f32.mrf.mxu1  ;;  %v1201_v47 = vunpack.c.h.b16 %v1040_v3  ;;  %v1200_v6 = vunpack.c.l.b16 %v1040_v3  ;;  %v681_v3 = vunpack.c.l.b16 %v515_v59  ;;  %v523_v59 = vunpack.c.l.b16 %v387_v51  ;;  %v2448_v51 = vpop.permute.xlu1 %1070 }
  0xdc   : > { %v1000_v36 = vadd.f32 %v999_v4, %v964_v15 }
  0xdd   : > { %568 = vrot.lane.b32.xlu1 %v563_v26, %s1921_s10  ;;  %588 = vrot.lane.b32.xlu0 %v584_v27, %s1922_s7  ;;  %v525_v26 = vunpack.c.h.b16 %v388_v2  ;;  %v634_v27 = vunpack.c.l.b16 %v490_v17  ;;  %v684_v41 = vpack.c.b16 %v681_v3, %v678_v25 }
  0xde   : > { %667 = vrot.lane.b32.xlu2 %v1593_v29, %s1917_s13  ;;  %v1005_v38 = vmax.f32 %v1000_v36, 0.0  ;;  %v522_v29 = vunpack.c.h.b16 %v386_v28 }
  0xe0   : > { %v2330_v43 = vpack.c.bf16 %v1005_v38, %v1004_v35  ;;  %v640_v38 = vpack.c.b16 %v637_v24, %v634_v27  ;;  %v528_v32 = vpack.c.b16 %v525_v26, %v522_v29 }
  0xe1   : > { %v2343_v53 = vld [vmem:[#allocation2] sm:$0xff]  ;;  %v2367_v22 = vld [vmem:[#allocation2 + $0x8] sm:$0xf] }
  0xe2   : > { %1009 = vst [vmem:[#allocation2 + $0x14] sm:$0xff] %v2330_v43  ;;  %v1042_v8 = vsel %vm2221_vm6, %v2330_v43, 0  ;;  %v1014_v12 = vsel %vm2186_vm14, %v2343_v53, 0  ;;  %v1015_v4 = vsel %vm2182_vm11, %v2367_v22, 0  ;;  %v1717_v52 = vld [vmem:[#allocation2 + $0x8] sm:$0xf] }
  0xe3   : > { %v1204_v48 = vunpack.c.h.b16 %v1042_v8  ;;  %v1203_v15 = vunpack.c.l.b16 %v1042_v8  ;;  %v1049_v30 = vunpack.c.h.b16 %v1014_v12  ;;  %v2386_v35 = vunpack.c.l.b16 %v1015_v4  ;;  %v1654_v31 = vld [vmem:[#allocation2 + $0x4] sm:$0xf]  ;;  %v1719_v24 = vld [vmem:[#allocation2 + $0x8] sm:$0xf] }
  0xe4   : > { %v1048_v37 = vunpack.c.l.b16 %v1014_v12  ;;  %v1714_v11 = vld [vmem:[#allocation2 + $0x4] sm:$0xf]  ;;  %v1038_v26 = vsel %vm2200_vm9, %v2330_v43, 0  ;;  %v1018_v3 = vsel %vm2257_vm1, %v2343_v53, 0  ;;  %v1158_v4 = vunpack.c.l.b16 %v1036_v10 }
  0xe5   : > { %590 = vrot.lane.b32.xlu1 %v585_v54, %s1922_s7  ;;  %621 = vrot.lane.b32.xlu0 %v618_v57, %s1918_s8  ;;  %v2352_v19 = vpack.c.b16 %v1204_v48, %v1201_v47  ;;  %v2375_v23 = vpack.c.b16 %v1203_v15, %v1200_v6  ;;  %v526_v54 = vunpack.c.l.b16 %v389_v42  ;;  %v638_v57 = vunpack.c.h.b16 %v492_v13  ;;  %v1642_v6 = vld [vmem:[#allocation2 + $0x8] sm:$0xf] }
  0xe6   : > { %564 = vrot.lane.b32.xlu2 %v561_v58, %s1921_s10  ;;  %v521_v47 = vunpack.c.l.b16 %v386_v28  ;;  %v2411_v15 = vsel %vm2156_vm4, %v2330_v43, 0  ;;  %v1083_v29 = vunpack.c.h.b16 %v1018_v3  ;;  %v1022_v40 = vsel %vm2135_vm13, %v2343_v53, 0 }
  0xe7   : > { %v529_v61 = vpack.c.b16 %v526_v54, %v523_v59  ;;  %v641_v1 = vpack.c.b16 %v638_v57, %v635_v60  ;;  %v1162_v42 = vunpack.c.h.b16 %v1038_v26  ;;  %v1104_v54 = vunpack.c.h.b16 %v1022_v40 }
  0xe8   : > { %v527_v14 = vpack.c.b16 %v524_v9, %v521_v47  ;;  %v1103_v57 = vunpack.c.l.b16 %v1022_v40  ;;  %v1019_v53 = vsel %vm2284_vm8, %v2367_v22, 0  ;;  %v1082_v9 = vunpack.c.l.b16 %v1018_v3 }
  0xe9   : > { %v2365_v21 = vld [vmem:[#allocation2 + $0x10] sm:$0xff]  ;;  %v2373_v45 = vld [vmem:[#allocation2 + $0x18] sm:$0xf]  ;;  %vm570_vm9 = vcmask 1031168  }
  0xea   : > { %v1016_v63 = vsel %vm2186_vm14, %v2365_v21, 0  ;;  %v1017_v34 = vsel %vm2182_vm11, %v2373_v45, 0  ;;  %v1648_v58 = vld [vmem:[#allocation2 + $0x14] sm:$0xf0]  ;;  %v1720_v7 = vld [vmem:[#allocation2 + $0x10] sm:$0xf0] }
  0xeb   : > { %v1052_v44 = vunpack.c.h.b16 %v1016_v63  ;;  %v2388_v36 = vunpack.c.l.b16 %v1017_v34  ;;  %v1051_v33 = vunpack.c.l.b16 %v1016_v63  ;;  %v1651_v62 = vor.u32 %v1717_v52, %v1648_v58  ;;  %v1636_v8 = vld [vmem:[#allocation2 + $0x10] sm:$0xf0]  ;;  %v1656_v2 = vld [vmem:[#allocation2 + $0x14] sm:$0xf0] }
  0xec   : > { %v1655_v48 = vor.u32 %v1720_v7, %v1654_v31  ;;  %v1639_v12 = vor.u32 %v1714_v11, %v1636_v8  ;;  %v1659_v25 = vor.u32 %v1719_v24, %v1656_v2  ;;  %v1020_v27 = vsel %vm2257_vm1, %v2365_v21, 0 }
  0xed   : > { %623 = vrot.lane.b32.xlu1 %v619_v16, %s1918_s8  ;;  %689 = vrot.lane.b32.xlu0 %v685_v18, %s1920_s9  ;;  %v2390_v39 = vpack.c.b16 %v1052_v44, %v1049_v30  ;;  %v1056_v46 = vpack.c.b16 %v2388_v36, %v2386_v35  ;;  %v2397_v49 = vpack.c.b16 %v1051_v33, %v1048_v37  ;;  %v1032_v16 = vsel %vm2156_vm4, %v2308_v20, 0  ;;  %v1718_v30 = vld [vmem:[#allocation2 + $0x10] sm:$0xf0]  ;;  %v2435_v44 = vpop.permute.xlu0 %669  ;;  %v1646_v33 = vld [vmem:[#allocation2 + $0x4] sm:$0xf] }
  0xee   : > { %586 = vrot.lane.b32.xlu2 %v583_v5, %s1922_s7  ;;  %v1141_v18 = vunpack.c.h.b16 %v2411_v15  ;;  %v1716_v5 = vld [vmem:[#allocation2 + $0x14] sm:$0xf0]  ;;  %v1138_v13 = vunpack.c.h.b16 %v1032_v16  ;;  %v1161_v63 = vunpack.c.l.b16 %v1038_v26  ;;  %v1086_v43 = vunpack.c.h.b16 %v1020_v27 }
  0xef   : > { %v1643_v17 = vor.u32 %v1716_v5, %v1642_v6  ;;  %v1024_v50 = vsel %vm2135_vm13, %v2365_v21, 0  ;;  %v1159_v58 = vunpack.c.h.b16 %v1036_v10  ;;  %v1021_v52 = vsel %vm2284_vm8, %v2373_v45, 0 }
  0xf0   : > { %v1144_v28 = vpack.c.b16 %v1141_v18, %v1138_v13  ;;  %v1164_v34 = vpack.c.b16 %v1161_v63, %v1158_v4  ;;  %v1089_v37 = vpack.c.b16 %v1086_v43, %v1083_v29  ;;  %v1107_v20 = vunpack.c.h.b16 %v1024_v50 }
  0xf1   : > { %v1165_v60 = vpack.c.b16 %v1162_v42, %v1159_v58  ;;  %v1140_v7 = vunpack.c.l.b16 %v2411_v15  ;;  %v1084_v8 = vunpack.c.l.b16 %v1019_v53  ;;  %v1137_v31 = vunpack.c.l.b16 %v1032_v16 }
  0xf2   : > { %v1110_v59 = vpack.c.b16 %v1107_v20, %v1104_v54  ;;  %v1025_v0 = vsel %vm2131_vm12, %v2373_v45, 0  ;;  %v1023_v15 = vsel %vm2131_vm12, %v2367_v22, 0  ;;  %vm671_vm12 = vcmask 777216  }
  0xf3   : > { %v1108_v18 = vunpack.c.l.b16 %v1025_v0  ;;  %v1105_v5 = vunpack.c.l.b16 %v1023_v15  ;;  %vm649_vm13 = vcmask 785408   ;;  %vm693_vm4 = vcmask 769024  }
  0xf4   : > { %vm592_vm11 = vcmask 916480   ;;  %vm627_vm14 = vcmask 900096  }
  0xf5   : > { %643 = vrot.lane.b32.xlu1 %v640_v38, %s1919_s28  ;;  %744 = vrot.lane.b32.xlu0 %v528_v32, %s1916_s11  ;;  %v1647_v38 = vor.u32 %v1718_v30, %v1646_v33  ;;  %v2437_v32 = vpop.permute.xlu2 %543  ;;  %v1111_v13 = vpack.c.b16 %v1108_v18, %v1105_v5 }
  0xf6   : > { %687 = vrot.lane.b32.xlu2 %v684_v41, %s1920_s9  ;;  %v1106_v41 = vunpack.c.l.b16 %v1024_v50 }
  0xf8   : > { %v1109_v21 = vpack.c.b16 %v1106_v41, %v1103_v57 }
  0xfd   : > { %746 = vrot.lane.b32.xlu1 %v529_v61, %s1916_s11  ;;  %1130 = vrot.lane.b32.xlu0 %v1651_v62, %s1911_s15  ;;  %v2453_v61 = vpop.permute.xlu0 %706  ;;  %v1087_v62 = vunpack.c.l.b16 %v1021_v52 }
  0xfe   : > { %645 = vrot.lane.b32.xlu2 %v641_v1, %s1919_s28  ;;  %v1085_v1 = vunpack.c.l.b16 %v1020_v27 }
  0xff   : > { %v1090_v47 = vpack.c.b16 %v1087_v62, %v1084_v8 }
 0x105   : > { %1188 = vrot.lane.b32.xlu1 %v1655_v48, %s1917_s13  ;;  %1072 = vrot.lane.b32.xlu0 %v1639_v12, %s1912_s26  ;;  %v1088_v48 = vpack.c.b16 %v1085_v1, %v1082_v9  ;;  %v1143_v12 = vpack.c.b16 %v1140_v7, %v1137_v31 }
 0x106   : > { %742 = vrot.lane.b32.xlu2 %v527_v14, %s1916_s11  ;;  %v1193_v14 = vpop.permute.xlu0 %1192 }
 0x10d   : > { %1074 = vrot.lane.b32.xlu1 %v1643_v17, %s1912_s26  ;;  %1148 = vrot.lane.b32.xlu0 %v1144_v28, %s1918_s8  ;;  %s2732_s26 = scalar_lea.vmem [#allocation6], %s1558_s14  ;;  %s1727_s14 = sshll.u32 %s1976_s22, 7 }
 0x10e   : > { %1190 = vrot.lane.b32.xlu2 %v1659_v25, %s1917_s13  ;;  %s1473_s13 = scalar_lea.hbm %s2805_s5, %s1727_s14  ;;  %s1474_s22 = sshll.u32 %s2732_s26, 4  ;;  %s1475_s22 = int_to_ptr.vmem [resolvable:$true] %s1474_s22 }
 0x10f   : > { %s1476_s16 = sshll.u32 %s1473_s13, 4  ;;  %s1477_s16 = int_to_ptr.hbm [resolvable:$true] %s1476_s16 }
 0x114   : > { %v2464_v11 = vpop.permute.xlu1 %625 }
 0x115   : > { %1167 = vrot.lane.b32.xlu1 %v1164_v34, %s1919_s28  ;;  %1093 = vrot.lane.b32.xlu0 %v1089_v37, %s1921_s10 }
 0x116   : > { %1128 = vrot.lane.b32.xlu2 %v1647_v38, %s1911_s15 }
 0x11c   : > { %v2458_v56 = vpop.permute.xlu2 %691  ;;  %v2475_v2 = vpop.permute.xlu1 %1150 }
 0x11d   : > { %1114 = vrot.lane.b32.xlu1 %v1110_v59, %s1922_s7  ;;  %1112 = vrot.lane.b32.xlu0 %v1109_v21, %s1922_s7 }
 0x11e   : > { %1169 = vrot.lane.b32.xlu2 %v1165_v60, %s1919_s28 }
 0x125   : > { %1095 = vrot.lane.b32.xlu1 %v1090_v47, %s1921_s10  ;;  %1091 = vrot.lane.b32.xlu0 %v1088_v48, %s1921_s10 }
 0x126   : > { %1146 = vrot.lane.b32.xlu2 %v1143_v12, %s1918_s8  ;;  %s1854_s8 = sshra.s32 %s1477_s16, 4  ;;  %s1855_s8 = int_to_ptr.hbm [resolvable:$true] %s1854_s8 }
 0x127   : > { %s1856_s28 = scalar_lea.hbm %s1855_s8, 128  ;;  %p1861_p0 = scmp.lt.s32.totalorder %s1855_s8, %s2805_s5 }
 0x128   : > { %v604_v16 = vpop.permute.xlu2 %603  ;;  %p1857_p6 = scmp.ne.s32.totalorder %s1855_s8, %s1856_s28 }
 0x12a   : > { %p1858_p9 = pnand %p1857_p6, %p2005_p11 }
 0x12b   : > { %v648_v45 = vpop.permute.xlu0 %647 }
 0x12c   : > { %p1859_p13 = pneg %p1858_p9 }
 0x12d   : > { %766 = vrot.lane.b32.xlu1 %v604_v16, %s1916_s11  ;;  %1211 = vrot.lane.b32.xlu0 %v2352_v19, %s1920_s9 }
 0x12e   : > { %1116 = vrot.lane.b32.xlu2 %v1111_v13, %s1922_s7  ;;  %s1860_s7 = scalar_lea.hbm %s2805_s5, 256 }
 0x12f   : > { %p1862_p1 = scmp.lt.s32.totalorder %s1860_s7, %s1856_s28 }
 0x130   : > { %v606_v6 = vpop.permute.xlu2 %605 }
 0x131   : > { %v607_v3 = vsel %vm370_vm5, %v604_v16, %v606_v6  ;;  %p1863_p3 = por %p1862_p1, %p1861_p0 }
 0x133   : > { %v2485_v55 = vpop.permute.xlu0 %1171  ;;  %p1864_p4 = pnand %p1863_p3, %p1859_p13 }
 0x134   : > { %v2481_v17 = vpop.permute.xlu1 %1213 }
 0x136   : > { %1209 = vrot.lane.b32.xlu2 %v2375_v23, %s1920_s9 }
 0x138   : > { %v668_v22 = vpop.permute.xlu2 %667 }
 0x139   : > { %v673_v19 = vsel %vm671_vm12, %v668_v22, %v2435_v44 }
 0x13e   : > { %770 = vrot.lane.b32.xlu2 %v606_v6, %s1916_s11 }
 0x13f   : > { %v546_v28 = vpop.permute.xlu0 %545  ;;  %v548_v24 = vpop.permute.xlu1 %547 }
 0x140   : > { %v2488_v25 = vpop.permute.xlu2 %564  ;;  %752 = vrot.lane.b32.xlu1 %v548_v24, %s1916_s11  ;;  %v550_v4 = vsel %vm422_vm7, %v546_v28, %v548_v24  ;;  %v549_v30 = vsel %vm422_vm7, %v2437_v32, %v546_v28 }
 0x146   : > { %788 = vrot.lane.b32.xlu2 %v673_v19, %s1916_s11 }
 0x147   : > { %v666_v26 = vpop.permute.xlu1 %665  ;;  %v567_v27 = vpop.permute.xlu0 %566 }
 0x148   : > { %v587_v23 = vpop.permute.xlu2 %586  ;;  %784 = vrot.lane.b32.xlu0 %v666_v26, %s1916_s11  ;;  %v672_v10 = vsel %vm671_vm12, %v666_v26, %v668_v22 }
 0x149   : > { %786 = vrot.lane.b32.xlu1 %v672_v10, %s1916_s11 }
 0x14e   : > { %768 = vrot.lane.b32.xlu2 %v607_v3, %s1916_s11 }
 0x14f   : > { %v569_v63 = vpop.permute.xlu1 %568  ;;  %v589_v43 = vpop.permute.xlu0 %588 }
 0x150   : > { %v688_v29 = vpop.permute.xlu2 %687  ;;  %750 = vrot.lane.b32.xlu0 %v550_v4, %s1916_s11  ;;  %v593_v8 = vsel %vm592_vm11, %v587_v23, %v589_v43  ;;  %v572_v9 = vsel %vm570_vm9, %v567_v27, %v569_v63 }
 0x151   : > { %790 = vrot.lane.b32.xlu1 %v688_v29, %s1916_s11 }
 0x156   : > { %748 = vrot.lane.b32.xlu2 %v549_v30, %s1916_s11 }
 0x157   : > { %v591_v44 = vpop.permute.xlu1 %590  ;;  %v622_v34 = vpop.permute.xlu0 %621 }
 0x158   : > { %v646_v37 = vpop.permute.xlu2 %645  ;;  %v594_v53 = vsel %vm592_vm11, %v589_v43, %v591_v44 }
 0x159   : > { %v651_v21 = vsel %vm649_vm13, %v646_v37, %v648_v45 }
 0x15e   : > { %772 = vrot.lane.b32.xlu2 %v622_v34, %s1916_s11 }
 0x15f   : > { %v624_v33 = vpop.permute.xlu1 %623  ;;  %v690_v38 = vpop.permute.xlu0 %689 }
 0x160   : > { %v743_v50 = vpop.permute.xlu2 %742  ;;  %v694_v57 = vsel %vm693_vm4, %v688_v29, %v690_v38  ;;  %v628_v1 = vsel %vm627_vm14, %v622_v34, %v624_v33  ;;  %v629_v47 = vsel %vm627_vm14, %v624_v33, %v2464_v11  ;;  %v695_v16 = vsel %vm693_vm4, %v690_v38, %v2458_v56 }
 0x166   : > { %764 = vrot.lane.b32.xlu2 %v591_v44, %s1916_s11 }
 0x167   : > { %v644_v40 = vpop.permute.xlu1 %643  ;;  %v745_v20 = vpop.permute.xlu0 %744 }
 0x168   : > { %v1191_v41 = vpop.permute.xlu2 %1190  ;;  %778 = vrot.lane.b32.xlu0 %v644_v40, %s1916_s11  ;;  %v650_v32 = vsel %vm649_vm13, %v644_v40, %v646_v37  ;;  %v2510_v42 = vsel %vm497_vm0, %v743_v50, %v745_v20 }
 0x169   : > { %780 = vrot.lane.b32.xlu1 %v650_v32, %s1916_s11  ;;  %v1195_v54 = vsel %vm671_vm12, %v1191_v41, %v1193_v14  ;;  %v571_v14 = vsel %vm570_vm9, %v2488_v25, %v567_v27 }
 0x16e   : > { %792 = vrot.lane.b32.xlu2 %v694_v57, %s1916_s11 }
 0x16f   : > { %v747_v58 = vpop.permute.xlu1 %746  ;;  %v1131_v52 = vpop.permute.xlu0 %1130 }
 0x170   : > { %v1129_v59 = vpop.permute.xlu2 %1128  ;;  %758 = vrot.lane.b32.xlu0 %v569_v63, %s1916_s11  ;;  %v2519_v60 = vsel %vm497_vm0, %v745_v20, %v747_v58  ;;  %v702_v58 = vld [vmem:[%s2804_s4 + $0x10] sm:$0xff] }
 0x171   : > { %782 = vrot.lane.b32.xlu1 %v651_v21, %s1916_s11  ;;  %v1132_v5 = vsel %vm370_vm5, %v1129_v59, %v1131_v52 }
 0x176   : > { %762 = vrot.lane.b32.xlu2 %v594_v53, %s1916_s11  ;;  %v1224_v53 = vld [vmem:[%s2804_s4 + $0x18] sm:$0xff] }
 0x177   : > { %v1189_v62 = vpop.permute.xlu1 %1188  ;;  %v1073_v31 = vpop.permute.xlu0 %1072 }
 0x178   : > { %v1170_v7 = vpop.permute.xlu2 %1169  ;;  %774 = vrot.lane.b32.xlu0 %v628_v1, %s1916_s11  ;;  %v1194_v0 = vsel %vm671_vm12, %v1189_v62, %v1191_v41 }
 0x179   : > { %760 = vrot.lane.b32.xlu1 %v593_v8, %s1916_s11  ;;  %v1174_v23 = vsel %vm649_vm13, %v1170_v7, %v2485_v55  ;;  %v1076_v55 = vsel %vm422_vm7, %v2448_v51, %v1073_v31  ;;  %v1711_v8 = vld [vmem:[%s2803_s3 + $0x14] sm:$0xf] }
 0x17e   : > { %756 = vrot.lane.b32.xlu2 %v572_v9, %s1916_s11  ;;  %v1610_v9 = vld [vmem:[%s2803_s3 + $0x18] sm:$0xf0] }
 0x17f   : > { %v1075_v48 = vpop.permute.xlu1 %1074  ;;  %v1149_v11 = vpop.permute.xlu0 %1148 }
 0x180   : > { %v1147_v12 = vpop.permute.xlu2 %1146  ;;  %776 = vrot.lane.b32.xlu0 %v629_v47, %s1916_s11  ;;  %v1077_v22 = vsel %vm422_vm7, %v1073_v31, %v1075_v48  ;;  %v1153_v4 = vsel %vm627_vm14, %v1149_v11, %v2475_v2  ;;  %vm832_vm7 = vcmask 130048   ;;  %v1613_v47 = vor.u32 %v1711_v8, %v1610_v9 }
 0x181   : > { %754 = vrot.lane.b32.xlu1 %v571_v14, %s1916_s11  ;;  %v1152_v26 = vsel %vm627_vm14, %v1147_v12, %v1149_v11 }
 0x186   : > { %1307 = vrot.lane.b32.xlu2 %v1194_v0, %s1916_s11 }
 0x187   : > { %v1168_v18 = vpop.permute.xlu1 %1167  ;;  %v1094_v45 = vpop.permute.xlu0 %1093 }
 0x188   : > { %v1117_v15 = vpop.permute.xlu2 %1116  ;;  %1291 = vrot.lane.b32.xlu0 %v1131_v52, %s1916_s11  ;;  %v1173_v24 = vsel %vm649_vm13, %v1168_v18, %v1170_v7  ;;  %v1221_v52 = vld [vmem:[%s2804_s4] sm:$0xff] }
 0x189   : > { %794 = vrot.lane.b32.xlu1 %v695_v16, %s1916_s11 }
 0x18e   : > { %1289 = vrot.lane.b32.xlu2 %v1132_v5, %s1916_s11 }
 0x18f   : > { %v1115_v6 = vpop.permute.xlu1 %1114  ;;  %v1113_v28 = vpop.permute.xlu0 %1112 }
 0x190   : > { %v2544_v13 = vpop.permute.xlu2 %1209  ;;  %1309 = vrot.lane.b32.xlu0 %v1195_v54, %s1916_s11  ;;  %v1119_v34 = vsel %vm592_vm11, %v1115_v6, %v1117_v15  ;;  %v1118_v2 = vsel %vm592_vm11, %v1113_v28, %v1115_v6 }
 0x191   : > { %1305 = vrot.lane.b32.xlu1 %v1189_v62, %s1916_s11 }
 0x196   : > { %1271 = vrot.lane.b32.xlu2 %v1077_v22, %s1916_s11 }
 0x197   : > { %v1096_v25 = vpop.permute.xlu1 %1095  ;;  %v1092_v27 = vpop.permute.xlu0 %1091 }
 0x198   : > { %v771_v56 = vpop.permute.xlu2 %770  ;;  %1285 = vrot.lane.b32.xlu0 %v1117_v15, %s1916_s11  ;;  %v1098_v38 = vsel %vm570_vm9, %v1094_v45, %v1096_v25  ;;  %v1097_v40 = vsel %vm570_vm9, %v1092_v27, %v1094_v45 }
 0x199   : > { %1287 = vrot.lane.b32.xlu1 %v1129_v59, %s1916_s11 }
 0x19e   : > { %1301 = vrot.lane.b32.xlu2 %v1173_v24, %s1916_s11 }
 0x19f   : > { %v767_v10 = vpop.permute.xlu1 %766  ;;  %v1212_v30 = vpop.permute.xlu0 %1211 }
 0x1a0   : > { %v789_v19 = vpop.permute.xlu2 %788  ;;  %1279 = vrot.lane.b32.xlu0 %v1096_v25, %s1916_s11  ;;  %v1215_v20 = vsel %vm693_vm4, %v2544_v13, %v1212_v30  ;;  %v1216_v41 = vsel %vm693_vm4, %v1212_v30, %v2481_v17  ;;  %v1602_v17 = vld [vmem:[%s2803_s3 + $0x8] sm:$0xf0] }
 0x1a1   : > { %1299 = vrot.lane.b32.xlu1 %v1168_v18, %s1916_s11 }
 0x1a6   : > { %1295 = vrot.lane.b32.xlu2 %v1152_v26, %s1916_s11 }
 0x1a8   : > { %v769_v3 = vpop.permute.xlu2 %768  ;;  %1303 = vrot.lane.b32.xlu0 %v1174_v23, %s1916_s11  ;;  %v1600_v23 = vld [vmem:[%s2803_s3] sm:$0xf] }
 0x1a9   : > { %1293 = vrot.lane.b32.xlu1 %v1147_v12, %s1916_s11  ;;  %v2563_v63 = vsel %vm497_vm0, %v767_v10, %v769_v3  ;;  %v2566_v43 = vsel %vm497_vm0, %v769_v3, %v771_v56  ;;  %v1710_v10 = vld [vmem:[%s2803_s3 + $0x4] sm:$0xf0] }
 0x1ae   : > { %1265 = vrot.lane.b32.xlu2 %v2390_v39, %s1916_s11 }
 0x1b0   : > { %v2572_v29 = vpop.permute.xlu2 %748  ;;  %1297 = vrot.lane.b32.xlu0 %v1153_v4, %s1916_s11 }
 0x1b1   : > { %1269 = vrot.lane.b32.xlu1 %v1076_v55, %s1916_s11 }
 0x1b2   : > { %v2578_v44 = vpop.permute.xlu1 %752 }
 0x1b6   : > { %1283 = vrot.lane.b32.xlu2 %v1119_v34, %s1916_s11 }
 0x1b8   : > { %v773_v39 = vpop.permute.xlu2 %772  ;;  %1273 = vrot.lane.b32.xlu0 %v1075_v48, %s1916_s11 }
 0x1b9   : > { %1281 = vrot.lane.b32.xlu1 %v1118_v2, %s1916_s11 }
 0x1ba   : > { %v785_v37 = vpop.permute.xlu0 %784 }
 0x1bb   : > { %v787_v33 = vpop.permute.xlu1 %786 }
 0x1bc   : > { %v810_v51 = vsel %vm497_vm0, %v785_v37, %v787_v33  ;;  %v811_v36 = vsel %vm497_vm0, %v787_v33, %v789_v19  ;;  %v1608_v37 = vld [vmem:[%s2803_s3 + $0x10] sm:$0xf] }
 0x1bd   : > { %839 = vmatpush.bf16.msra.mxu2 %v810_v51 }
 0x1be   : > { %1277 = vrot.lane.b32.xlu2 %v1098_v38, %s1916_s11 }
 0x1c0   : > { %v2588_v50 = vpop.permute.xlu2 %764  ;;  %1267 = vrot.lane.b32.xlu0 %v1056_v46, %s1916_s11  ;;  %v1709_v46 = vld [vmem:[%s2803_s3 + $0x4] sm:$0xf] }
 0x1c1   : > { %1275 = vrot.lane.b32.xlu1 %v1097_v40, %s1916_s11  ;;  %v1605_v57 = vor.u32 %v1709_v46, %v1602_v17 }
 0x1c2   : > { %v751_v21 = vpop.permute.xlu0 %750 }
 0x1c3   : > { %v791_v32 = vpop.permute.xlu1 %790  ;;  %v798_v19 = vsel %vm497_vm0, %v2572_v29, %v751_v21  ;;  %v799_v55 = vsel %vm497_vm0, %v751_v21, %v2578_v44  ;;  %v1712_v44 = vld [vmem:[%s2803_s3 + $0x14] sm:$0xf0] }
 0x1c4   : > { %v1609_v33 = vor.u32 %v1712_v44, %v1608_v37 }
 0x1c6   : > { %1313 = vrot.lane.b32.xlu2 %v1215_v20, %s1916_s11 }
 0x1c8   : > { %v2601_v54 = vpop.permute.xlu2 %792  ;;  %1315 = vrot.lane.b32.xlu0 %v1216_v41, %s1916_s11 }
 0x1c9   : > { %1263 = vrot.lane.b32.xlu1 %v2397_v49, %s1916_s11  ;;  %v812_v35 = vsel %vm497_vm0, %v791_v32, %v2601_v54  ;;  %v701_v49 = vld [vmem:[%s2804_s4 + $0x8] sm:$0xff] }
 0x1ca   : > { %865 = vmatpush.bf16.msra.mxu3 %v812_v35 }
 0x1cd   : > { %1614 = vmatmul.msk.bf16.vlgmr.msra.gmra.mxu3 %vm832_vm7, %v1605_v57 }
 0x1ce   : > { %877 = vmatpush.bf16.msrb.mxu3 %v811_v36  ;;  %1311 = vrot.lane.b32.xlu2 %v2544_v13, %s1916_s11 }
 0x1d0   : > { %v763_v59 = vpop.permute.xlu2 %762  ;;  %711 = vperm.xlu0 %1791, %v701_v49  }
 0x1d1   : > { %716 = vperm.xlu1 %1792, %v702_v58   ;;  %v803_v26 = vsel %vm497_vm0, %v763_v59, %v2588_v50 }
 0x1d6   : > { %721 = vperm.xlu2 %1793, %v1224_v53  }
 0x1d8   : > { %v757_v62 = vpop.permute.xlu2 %756  ;;  %1227 = vperm.xlu0 %1791, %v1221_v52  }
 0x1d9   : > { %1232 = vperm.xlu1 %1792, %v701_v49   ;;  %v1722_v49 = vld [vmem:[%s2803_s3 + $0x4] sm:$0xf] }
 0x1da   : > { %v779_v1 = vpop.permute.xlu0 %778 }
 0x1db   : > { %v781_v7 = vpop.permute.xlu1 %780 }
 0x1dc   : > { %v808_v31 = vsel %vm497_vm0, %v779_v1, %v781_v7 }
 0x1dd   : > { %840 = vmatpush.bf16.msra.mxu2 %v808_v31  ;;  %1615 = vmatmul.msk.bf16.gmra.mxu3 %vm832_vm7, %v1613_v47 }
 0x1de   : > { %1237 = vperm.xlu2 %1793, %v702_v58   ;;  %v1668_v58 = vld [vmem:[%s2803_s3 + $0x8] sm:$0xf0] }
 0x1e0   : > { %v1308_v48 = vpop.permute.xlu2 %1307  ;;  %1242 = vperm.xlu0 %1791, %v1224_v53   ;;  %v1671_v53 = vor.u32 %v1722_v49, %v1668_v58  ;;  %v1797_v58 = vld [vmem:[%s2047_s25 + $0x20] sm:$0xff] }
 0x1e2   : > { %v759_v12 = vpop.permute.xlu0 %758 }
 0x1e3   : > { %v783_v14 = vpop.permute.xlu1 %782  ;;  %v801_v3 = vsel %vm497_vm0, %v757_v62, %v759_v12 }
 0x1e4   : > { %v809_v0 = vsel %vm497_vm0, %v781_v7, %v783_v14  ;;  %v1666_v14 = vld [vmem:[%s2803_s3] sm:$0xf] }
 0x1e5   : > { %878 = vmatpush.bf16.msrb.mxu3 %v809_v0  ;;  %v1723_v0 = vld [vmem:[%s2803_s3 + $0x4] sm:$0xf0] }
 0x1e8   : > { %v2639_v15 = vpop.permute.xlu2 %1289 }
 0x1ea   : > { %v775_v16 = vpop.permute.xlu0 %774 }
 0x1eb   : > { %v761_v11 = vpop.permute.xlu1 %760  ;;  %v806_v18 = vsel %vm497_vm0, %v773_v39, %v775_v16 }
 0x1ec   : > { %841 = vmatpush.bf16.msra.mxu2 %v806_v18  ;;  %v802_v6 = vsel %vm497_vm0, %v761_v11, %v763_v59  ;;  %v1667_v18 = vor.u32 %v1723_v0, %v1666_v14  ;;  %v1800_v0 = vld [vmem:[%s2047_s25 + $0x30] sm:$0xff] }
 0x1f0   : > { %v2642_v5 = vpop.permute.xlu2 %1271  ;;  %842 = vmatpush.bf16.msra.mxu2 %v2563_v63  ;;  %v1601_v63 = vor.u32 %v1710_v10, %v1600_v23 }
 0x1f2   : > { %v777_v13 = vpop.permute.xlu0 %776 }
 0x1f3   : > { %v755_v45 = vpop.permute.xlu1 %754  ;;  %v807_v22 = vsel %vm497_vm0, %v775_v16, %v777_v13  ;;  %v1676_v16 = vld [vmem:[%s2803_s3 + $0x18] sm:$0xf0] }
 0x1f4   : > { %843 = vmatpush.bf16.msra.mxu2 %v802_v6  ;;  %879 = vmatpush.bf16.msrb.mxu3 %v807_v22  ;;  %v800_v56 = vsel %vm497_vm0, %v755_v45, %v757_v62 }
 0x1f8   : > { %v1302_v28 = vpop.permute.xlu2 %1301  ;;  %844 = vmatpush.bf16.msra.mxu2 %v800_v56  ;;  %880 = vmatpush.bf16.msrb.mxu3 %v2566_v43 }
 0x1fa   : > { %v1292_v24 = vpop.permute.xlu0 %1291 }
 0x1fb   : > { %v795_v25 = vpop.permute.xlu1 %794  ;;  %v1326_v59 = vsel %vm497_vm0, %v2639_v15, %v1292_v24  ;;  %v1725_v24 = vld [vmem:[%s2803_s3 + $0x14] sm:$0xf0] }
 0x1fc   : > { %845 = vmatpush.bf16.msra.mxu2 %v798_v19  ;;  %881 = vmatpush.bf16.msrb.mxu3 %v803_v26  ;;  %v813_v27 = vsel %vm497_vm0, %v2601_v54, %v795_v25 }
 0x1fd   : > { %903 = vmatpush.bf16.msrb.mxu0 %v813_v27 }
 0x200   : > { %v1296_v43 = vpop.permute.xlu2 %1295  ;;  %846 = vmatpush.bf16.msra.mxu2 %v2510_v42  ;;  %882 = vmatpush.bf16.msrb.mxu3 %v801_v3 }
 0x201   : > { %1616 = vmatmul.msk.bf16.vlgmr.msrb.gmra.mxu0 %vm832_vm7, %v1605_v57 }
 0x202   : > { %v1310_v4 = vpop.permute.xlu0 %1309 }
 0x203   : > { %v1306_v29 = vpop.permute.xlu1 %1305  ;;  %847 = vmatmul.bf16.vlgmr.msra.gmra.mxu2 %v1601_v63  ;;  %v1332_v30 = vsel %vm497_vm0, %v1308_v48, %v1310_v4 }
 0x204   : > { %v1331_v34 = vsel %vm497_vm0, %v1306_v29, %v1308_v48  ;;  %883 = vmatpush.bf16.msrb.mxu3 %v799_v55  ;;  %1397 = vmatpush.bf16.msrb.mxu2 %v1332_v30  ;;  %v1794_v55 = vld [vmem:[%s2047_s25] sm:$0xff] }
 0x205   : > { %1359 = vmatpush.bf16.msra.mxu0 %v1331_v34 }
 0x208   : > { %v2668_v39 = vpop.permute.xlu2 %1265  ;;  %884 = vmatpush.bf16.msrb.mxu3 %v2519_v60 }
 0x20a   : > { %v1286_v42 = vpop.permute.xlu0 %1285 }
 0x20b   : > { %v1288_v2 = vpop.permute.xlu1 %1287  ;;  %885 = vmatmul.bf16.vlgmr.msrb.gmra.mxu3 %v1601_v63 }
 0x20c   : > { %v1325_v36 = vsel %vm497_vm0, %v1288_v2, %v2639_v15  ;;  %v1724_v15 = vld [vmem:[%s2803_s3 + $0x14] sm:$0xf] }
 0x20d   : > { %v1679_v45 = vor.u32 %v1724_v15, %v1676_v16 }
 0x210   : > { %v1284_v51 = vpop.permute.xlu2 %1283 }
 0x211   : > { %1617 = vmatmul.msk.bf16.gmra.mxu0 %vm832_vm7, %v1613_v47  ;;  %v1324_v7 = vsel %vm497_vm0, %v1284_v51, %v1286_v42 }
 0x212   : > { %v1280_v38 = vpop.permute.xlu0 %1279 }
 0x213   : > { %v1300_v50 = vpop.permute.xlu1 %1299  ;;  %852 = vmatmul.bf16.gmra.mxu2 %v1609_v33 }
 0x214   : > { %v1329_v60 = vsel %vm497_vm0, %v1300_v50, %v1302_v28 }
 0x215   : > { %1360 = vmatpush.bf16.msra.mxu0 %v1329_v60  ;;  %v1795_v60 = vld [vmem:[%s2047_s25 + $0x10] sm:$0xff] }
 0x218   : > { %v1278_v40 = vpop.permute.xlu2 %1277 }
 0x219   : > { %v1322_v9 = vsel %vm497_vm0, %v1278_v40, %v1280_v38 }
 0x21a   : > { %v1304_v20 = vpop.permute.xlu0 %1303 }
 0x21b   : > { %v1294_v41 = vpop.permute.xlu1 %1293  ;;  %890 = vmatmul.bf16.gmra.mxu3 %v1609_v33  ;;  %v1330_v32 = vsel %vm497_vm0, %v1302_v28, %v1304_v20  ;;  %v1796_v20 = vld [vmem:[%s2047_s25 + $0x8] sm:$0xff] }
 0x21c   : > { %1398 = vmatpush.bf16.msrb.mxu2 %v1330_v32  ;;  %v1327_v54 = vsel %vm497_vm0, %v1294_v41, %v1296_v43 }
 0x21d   : > { %1361 = vmatpush.bf16.msra.mxu0 %v1327_v54 }
 0x220   : > { %v1314_v35 = vpop.permute.xlu2 %1313 }
 0x221   : > { %1362 = vmatpush.bf16.msra.mxu0 %v1325_v36 }
 0x222   : > { %v1298_v46 = vpop.permute.xlu0 %1297 }
 0x223   : > { %v1270_v17 = vpop.permute.xlu1 %1269  ;;  %v1328_v57 = vsel %vm497_vm0, %v1296_v43, %v1298_v46 }
 0x224   : > { %1399 = vmatpush.bf16.msrb.mxu2 %v1328_v57  ;;  %v1319_v13 = vsel %vm497_vm0, %v1270_v17, %v2642_v5 }
 0x228   : > { %v1312_v21 = vpop.permute.xlu2 %1311  ;;  %1400 = vmatpush.bf16.msrb.mxu2 %v1326_v59 }
 0x229   : > { %v1333_v52 = vsel %vm497_vm0, %v1312_v21, %v1314_v35  ;;  %v1798_v21 = vld [vmem:[%s2047_s25 + $0x18] sm:$0xff] }
 0x22a   : > { %1385 = vmatpush.bf16.msrb.mxu1 %v1333_v52  ;;  %v1274_v62 = vpop.permute.xlu0 %1273 }
 0x22b   : > { %v1282_v1 = vpop.permute.xlu1 %1281  ;;  %v1320_v48 = vsel %vm497_vm0, %v2642_v5, %v1274_v62  ;;  %v1674_v5 = vld [vmem:[%s2803_s3 + $0x10] sm:$0xf] }
 0x22c   : > { %1401 = vmatpush.bf16.msrb.mxu2 %v1324_v7  ;;  %v1323_v8 = vsel %vm497_vm0, %v1282_v1, %v1284_v51  ;;  %v1675_v25 = vor.u32 %v1725_v24, %v1674_v5 }
 0x22d   : > { %1363 = vmatpush.bf16.msra.mxu0 %v1323_v8  ;;  %1680 = vmatmul.msk.bf16.vlgmr.msrb.gmra.mxu1 %vm832_vm7, %v1671_v53 }
 0x230   : > { %1402 = vmatpush.bf16.msrb.mxu2 %v1322_v9  ;;  %v722_v49 = vpop.permute.xlu2 %721 }
 0x232   : > { %v1268_v31 = vpop.permute.xlu0 %1267 }
 0x233   : > { %v1276_v47 = vpop.permute.xlu1 %1275  ;;  %v1318_v11 = vsel %vm497_vm0, %v2668_v39, %v1268_v31 }
 0x234   : > { %1403 = vmatpush.bf16.msrb.mxu2 %v1320_v48  ;;  %v1321_v12 = vsel %vm497_vm0, %v1276_v47, %v1278_v40 }
 0x235   : > { %1364 = vmatpush.bf16.msra.mxu0 %v1321_v12  ;;  %v1799_v12 = vld [vmem:[%s2047_s25 + $0x28] sm:$0xff] }
 0x238   : > { %1404 = vmatpush.bf16.msrb.mxu2 %v1318_v11 }
 0x239   : > { %1365 = vmatpush.bf16.msra.mxu0 %v1319_v13 }
 0x23a   : > { %v1316_v6 = vpop.permute.xlu0 %1315 }
 0x23b   : > { %v1334_v22 = vsel %vm497_vm0, %v1314_v35, %v1316_v6  ;;  %v1264_v56 = vpop.permute.xlu1 %1263  ;;  %1405 = vmatmul.bf16.vlgmr.msrb.gmra.mxu2 %v1667_v18  ;;  %v1801_v6 = vld [vmem:[%s2047_s25 + $0x38] sm:$0xff] }
 0x23c   : > { %1423 = vmatpush.bf16.msra.mxu3 %v1334_v22  ;;  %v1317_v28 = vsel %vm497_vm0, %v1264_v56, %v2668_v39 }
 0x23d   : > { %1366 = vmatpush.bf16.msra.mxu0 %v1317_v28  ;;  %1681 = vmatmul.msk.bf16.gmra.mxu1 %vm832_vm7, %v1679_v45 }
 0x23f   : > { %1682 = vmatmul.msk.bf16.vlgmr.msra.gmra.mxu3 %vm832_vm7, %v1671_v53 }
 0x240   : > { %1367 = vmatmul.bf16.vlgmr.msra.gmra.mxu0 %v1667_v18 }
 0x242   : > { %v712_v29 = vpop.permute.xlu0 %711 }
 0x243   : > { %v717_v50 = vpop.permute.xlu1 %716 }
 0x24a   : > { %v1228_v28 = vpop.permute.xlu0 %1227 }
 0x24b   : > { %1410 = vmatmul.bf16.gmra.mxu2 %v1675_v25 }
 0x24f   : > { %1683 = vmatmul.msk.bf16.gmra.mxu3 %vm832_vm7, %v1679_v45 }
 0x250   : > { %1372 = vmatmul.bf16.gmra.mxu0 %v1675_v25  ;;  %v867_v19 = vpop.f32.mrf.mxu3 }
 0x258   : > { %v869_v26 = vpop.f32.mrf.mxu3 }
 0x260   : > { %v872_v27 = vpop.f32.mrf.mxu3 }
 0x268   : > { %v874_v23 = vpop.f32.mrf.mxu3 }
 0x27e   : > { %v905_v43 = vpop.f32.mrf.mxu0 }
 0x286   : > { %v848_v10 = vpop.f32.mrf.mxu2  ;;  %v907_v38 = vpop.f32.mrf.mxu0 }
 0x287   : > { %v849_v3 = vadd.f32 %v848_v10, %v2453_v61 }
 0x289   : > { %v868_v63 = vadd.f32 %v867_v19, %v849_v3 }
 0x28b   : > { %v915_v4 = vmax.f32 %v868_v63, 0.0  ;;  %v1802_v63 = vld [vmem:[%s2047_s25 + $0x40] sm:$0xff] }
 0x28d   : > { %v923_v30 = vadd.f32 %v1794_v55, %v915_v4  ;;  %v1233_v4 = vpop.permute.xlu1 %1232 }
 0x28e   : > { %v850_v34 = vpop.f32.mrf.mxu2  ;;  %v886_v39 = vpop.f32.mrf.mxu3 }
 0x28f   : > { %931 = vst [vmem:[%s2732_s26] sm:$0xff] %v923_v30  ;;  %v851_v42 = vadd.f32 %v850_v34, %v712_v29  ;;  %v887_v2 = vadd.f32 %v886_v39, %v2453_v61  ;;  %v910_v53 = vpop.f32.mrf.mxu0  ;;  %v1803_v39 = vld [vmem:[%s2047_s25 + $0x48] sm:$0xff] }
 0x291   : > { %v870_v37 = vadd.f32 %v869_v26, %v851_v42  ;;  %v906_v44 = vadd.f32 %v905_v43, %v887_v2 }
 0x293   : > { %v917_v33 = vmax.f32 %v870_v37, 0.0  ;;  %v916_v51 = vmax.f32 %v906_v44, 0.0 }
 0x295   : > { %v925_v40 = vadd.f32 %v1795_v60, %v917_v33  ;;  %v924_v41 = vadd.f32 %v1796_v20, %v916_v51 }
 0x296   : > { %v853_v32 = vpop.f32.mrf.mxu2  ;;  %v888_v54 = vpop.f32.mrf.mxu3 }
 0x297   : > { %933 = vst [vmem:[%s2732_s26 + $0x10] sm:$0xff] %v925_v40  ;;  %v854_v35 = vadd.f32 %v853_v32, %v717_v50  ;;  %v889_v36 = vadd.f32 %v888_v54, %v712_v29  ;;  %v912_v16 = vpop.f32.mrf.mxu0 }
 0x298   : > { %932 = vst [vmem:[%s2732_s26 + $0x8] sm:$0xff] %v924_v41 }
 0x299   : > { %v873_v61 = vadd.f32 %v872_v27, %v854_v35  ;;  %v908_v46 = vadd.f32 %v907_v38, %v889_v36  ;;  %v1238_v38 = vpop.permute.xlu2 %1237  ;;  %v1805_v35 = vld [vmem:[%s2047_s25 + $0x58] sm:$0xff] }
 0x29b   : > { %v919_v17 = vmax.f32 %v873_v61, 0.0  ;;  %v918_v57 = vmax.f32 %v908_v46, 0.0 }
 0x29d   : > { %v927_v59 = vadd.f32 %v1797_v58, %v919_v17  ;;  %v926_v52 = vadd.f32 %v1798_v21, %v918_v57  ;;  %v1806_v58 = vld [vmem:[%s2047_s25 + $0x60] sm:$0xff]  ;;  %v1243_v21 = vpop.permute.xlu0 %1242 }
 0x29e   : > { %v891_v62 = vpop.f32.mrf.mxu3  ;;  %v855_v1 = vpop.f32.mrf.mxu2 }
 0x29f   : > { %935 = vst [vmem:[%s2732_s26 + $0x20] sm:$0xff] %v927_v59  ;;  %v892_v7 = vadd.f32 %v891_v62, %v717_v50  ;;  %v856_v8 = vadd.f32 %v855_v1, %v722_v49  ;;  %v1804_v50 = vld [vmem:[%s2047_s25 + $0x50] sm:$0xff] }
 0x2a0   : > { %934 = vst [vmem:[%s2732_s26 + $0x18] sm:$0xff] %v926_v52 }
 0x2a1   : > { %v911_v9 = vadd.f32 %v910_v53, %v892_v7  ;;  %v875_v31 = vadd.f32 %v874_v23, %v856_v8  ;;  %v1807_v8 = vld [vmem:[%s2047_s25 + $0x68] sm:$0xff] }
 0x2a3   : > { %v920_v47 = vmax.f32 %v911_v9, 0.0  ;;  %v921_v48 = vmax.f32 %v875_v31, 0.0 }
 0x2a5   : > { %v928_v14 = vadd.f32 %v1799_v12, %v920_v47  ;;  %v929_v15 = vadd.f32 %v1800_v0, %v921_v48  ;;  %v1808_v0 = vld [vmem:[%s2047_s25 + $0x70] sm:$0xff] }
 0x2a6   : > { %v893_v11 = vpop.f32.mrf.mxu3 }
 0x2a7   : > { %936 = vst [vmem:[%s2732_s26 + $0x28] sm:$0xff] %v928_v14  ;;  %v894_v18 = vadd.f32 %v893_v11, %v722_v49  ;;  %v1809_v11 = vld [vmem:[%s2047_s25 + $0x78] sm:$0xff] }
 0x2a8   : > { %937 = vst [vmem:[%s2732_s26 + $0x30] sm:$0xff] %v929_v15 }
 0x2a9   : > { %v913_v13 = vadd.f32 %v912_v16, %v894_v18 }
 0x2aa   : > { %v1387_v56 = vpop.f32.mrf.mxu1 }
 0x2ab   : > { %v922_v45 = vmax.f32 %v913_v13, 0.0 }
 0x2ad   : > { %v930_v22 = vadd.f32 %v1801_v6, %v922_v45 }
 0x2af   : > { %938 = vst [vmem:[%s2732_s26 + $0x38] sm:$0xff] %v930_v22 }
 0x2b2   : > { %v1389_v3 = vpop.f32.mrf.mxu1 }
 0x2ba   : > { %v1392_v41 = vpop.f32.mrf.mxu1 }
 0x2bd   : > { %v1368_v5 = vpop.f32.mrf.mxu0 }
 0x2be   : > { %v1369_v24 = vadd.f32 %v1368_v5, %v1228_v28  ;;  %v1406_v25 = vpop.f32.mrf.mxu2 }
 0x2bf   : > { %v1407_v26 = vadd.f32 %v1406_v25, %v1228_v28 }
 0x2c0   : > { %v1388_v19 = vadd.f32 %v1387_v56, %v1369_v24 }
 0x2c2   : > { %v1435_v27 = vmax.f32 %v1388_v19, 0.0  ;;  %v1425_v23 = vpop.f32.mrf.mxu3  ;;  %v1394_v7 = vpop.f32.mrf.mxu1 }
 0x2c3   : > { %v1426_v10 = vadd.f32 %v1425_v23, %v1407_v26 }
 0x2c4   : > { %v1443_v43 = vadd.f32 %v1802_v63, %v1435_v27 }
 0x2c5   : > { %v1436_v29 = vmax.f32 %v1426_v10, 0.0  ;;  %v1370_v55 = vpop.f32.mrf.mxu0 }
 0x2c6   : > { %1684 = vst [vmem:[%s2732_s26 + $0x40] sm:$0xff] %v1443_v43  ;;  %v1371_v30 = vadd.f32 %v1370_v55, %v1233_v4  ;;  %v1408_v34 = vpop.f32.mrf.mxu2 }
 0x2c7   : > { %v1444_v42 = vadd.f32 %v1803_v39, %v1436_v29  ;;  %v1409_v37 = vadd.f32 %v1408_v34, %v1233_v4 }
 0x2c8   : > { %v1390_v2 = vadd.f32 %v1389_v3, %v1371_v30 }
 0x2c9   : > { %1685 = vst [vmem:[%s2732_s26 + $0x48] sm:$0xff] %v1444_v42 }
 0x2ca   : > { %v1437_v44 = vmax.f32 %v1390_v2, 0.0  ;;  %v1427_v33 = vpop.f32.mrf.mxu3 }
 0x2cb   : > { %v1428_v51 = vadd.f32 %v1427_v33, %v1409_v37 }
 0x2cc   : > { %v1445_v60 = vadd.f32 %v1804_v50, %v1437_v44 }
 0x2cd   : > { %v1438_v40 = vmax.f32 %v1428_v51, 0.0  ;;  %v1373_v20 = vpop.f32.mrf.mxu0 }
 0x2ce   : > { %1686 = vst [vmem:[%s2732_s26 + $0x50] sm:$0xff] %v1445_v60  ;;  %v1411_v32 = vpop.f32.mrf.mxu2  ;;  %v1374_v54 = vadd.f32 %v1373_v20, %v1238_v38 }
 0x2cf   : > { %v1446_v36 = vadd.f32 %v1805_v35, %v1438_v40  ;;  %v1412_v61 = vadd.f32 %v1411_v32, %v1238_v38 }
 0x2d0   : > { %v1393_v46 = vadd.f32 %v1392_v41, %v1374_v54 }
 0x2d1   : > { %1687 = vst [vmem:[%s2732_s26 + $0x58] sm:$0xff] %v1446_v36 }
 0x2d2   : > { %v1430_v17 = vpop.f32.mrf.mxu3  ;;  %v1439_v57 = vmax.f32 %v1393_v46, 0.0 }
 0x2d3   : > { %v1431_v49 = vadd.f32 %v1430_v17, %v1412_v61 }
 0x2d4   : > { %v1447_v59 = vadd.f32 %v1806_v58, %v1439_v57 }
 0x2d5   : > { %v1375_v52 = vpop.f32.mrf.mxu0  ;;  %v1440_v53 = vmax.f32 %v1431_v49, 0.0 }
 0x2d6   : > { %v1376_v62 = vadd.f32 %v1375_v52, %v1243_v21  ;;  %v1413_v1 = vpop.f32.mrf.mxu2  ;;  %1688 = vst [vmem:[%s2732_s26 + $0x60] sm:$0xff] %v1447_v59 }
 0x2d7   : > { %v1448_v9 = vadd.f32 %v1807_v8, %v1440_v53  ;;  %v1414_v47 = vadd.f32 %v1413_v1, %v1243_v21 }
 0x2d8   : > { %v1395_v31 = vadd.f32 %v1394_v7, %v1376_v62 }
 0x2d9   : > { %1689 = vst [vmem:[%s2732_s26 + $0x68] sm:$0xff] %v1448_v9 }
 0x2da   : > { %v1441_v48 = vmax.f32 %v1395_v31, 0.0  ;;  %v1432_v12 = vpop.f32.mrf.mxu3 }
 0x2db   : > { %v1433_v14 = vadd.f32 %v1432_v12, %v1414_v47 }
 0x2dc   : > { %v1449_v15 = vadd.f32 %v1808_v0, %v1441_v48 }
 0x2dd   : > { %v1442_v16 = vmax.f32 %v1433_v14, 0.0 }
 0x2de   : > { %1690 = vst [vmem:[%s2732_s26 + $0x70] sm:$0xff] %v1449_v15 }
 0x2df   : > { %v1450_v18 = vadd.f32 %v1809_v11, %v1442_v16 }
 0x2e1   : > { %1691 = vst [vmem:[%s2732_s26 + $0x78] sm:$0xff] %v1450_v18 }
 0x2e2   : > { %1867 = shalt.err (!%p1864_p4)
}
 0x2e3   : > { %s1923_s12 = smov 256   ;;  %s1924_s25 = smov 16  }
 0x2e4   : > { %1730 = dma.vmem_to_hbm [thread:$0]  (%p2005_p11), %s1475_s22, 2048, %s1477_s16, %s1461_s17, %s1923_s12, %s1923_s12, %s1924_s25  }
 0x2e5 PF: > { %s1491_s26 = sand.u32 1, %s1894_s18   ;;  %p2841_p7 = scmp.ge.s32.totalorder %s1906_s21, 2 }
 0x2e6   : > { %s1492_s14 = scalar_lea.sflag [#allocation5], %s1491_s26 }
 0x2e7   : > { %p1737_p5 = pnand %p2841_p7, %p2009_p12 }
 0x2e9   : > { %p1738_p8 = pneg %p1737_p5 }
 0x2eb   : > { %1889 = dma.done.wait (%p1738_p8), %s1492_s14, 2048  }
 0x2ec   : > { %1891 = vsyncadd (%p1738_p8), %s1492_s14, 4294965248  ;;  %p18_p10 = scmp.ge.s32.totalorder %s1980_s24, 4   ;;  %s2842_s18 = smov %s1898_s19 }
 0x2ed   : > { %s2843_s19 = smov %s1902_s20  ;;  %s2844_s20 = smov %s1992_s27 }
 0x2ee   : > { %s2845_s21 = smov %s1980_s24  ;;  %20 = sbr.rel (!%p18_p10) target bundleno = 5 (0x5), region = 87 }
 0x2f3   :  { %1498 = vsyncpa [#allocation4], 1 }
 0x2f4   :  { %1500 = vsyncpa [#allocation4 + $0x1], 1 }
 0x2f5   :  { %1501 = vsyncpa [#allocation5], 1 }
 0x2f6   :  { %1503 = vsyncpa [#allocation5 + $0x1], 1 }

</bundles_post_ra>
